<compile_context>
chip_gen: v7x
topology: tpu7x:2x2x1
jax: 0.10.0
libtpu: 0.0.40
codegen_flags: <defaults>
</compile_context>

<pallas_src>
import math

import jax
import jax.numpy as jnp
from jax import lax
from jax.experimental import pallas as pl
from jax.experimental.pallas import tpu as pltpu

# --- small config consistent with NormalizedTransformer(input_dim, hidden, layers, out) ---
BATCH = 2
INPUT_DIM = 16
HIDDEN = 32
NUM_LAYERS = 2
OUTPUT_DIM = 8
PROJ = 4                       # projection_dim == sequence ("views") length
NUM_HEADS = 4
HEAD_DIM = HIDDEN // NUM_HEADS
MLP_HIDDEN = 2 * HIDDEN
BP = BATCH * PROJ              # 8 activation rows
HB = NUM_HEADS * BP            # 32 head-stacked attention rows
LANES = PROJ * HIDDEN          # 128-lane slab width

EPS_NORM = 1e-12               # F.normalize eps
EPS_LN = 1e-5                  # nn.LayerNorm eps
ATTN_SCALE = 1.0 / math.sqrt(HEAD_DIM)
NEG_INF = -1e30

# ---- bf16 weight-slab layout (rows; all offsets are multiples of 16 for bf16 tiling) ----
W_PCA = 0                      # 16 rows, cols 0:H          pca_w.T
W_VG = 16                      # 32 rows, cols 0:P*H        vg_w.T
W_REG = 48                     # 32 rows, cols 0:128        reg_w.T zero-padded (lane-dense out)
W_LAYER = 80                   # per-layer chunk starts here
W_QKV_OFF = 0                  # 32 rows, cols 0:3H
W_WO_OFF = 32                  # 32 rows, cols 0:H
W_W1_OFF = 64                  # 32 rows, cols 0:2H
W_W2_OFF = 96                  # 64 rows, cols 0:H
W_ROWS_PER_LAYER = 160
W_TOTAL = W_LAYER + NUM_LAYERS * W_ROWS_PER_LAYER          # 400 rows x 128 lanes bf16

# ---- f32 constant-slab layout (rows; offsets multiples of 8 for f32 tiling) ----
C_PCA_B = 0
C_VG_B = 1
C_LN_G = 2
C_LN_B = 3
C_REG_B = 4                    # cols 0:128 (only 0:OUTPUT_DIM nonzero)
C_PE = 8                       # BP rows, cols 0:H          concat([pe]*BATCH)
C_MASK = 16                    # HB rows,  cols 0:HB        block-diag additive mask
C_AVG = 48                     # BATCH rows, cols 0:BP      per-batch mean-over-views
C_LAYER = 56                   # per layer 8 rows: bqkv | bo | b1 | b2
C_ROWS_PER_LAYER = 8
C_TOTAL = C_LAYER + NUM_LAYERS * C_ROWS_PER_LAYER          # 72 rows x 128 lanes f32


def _l2norm(v):
    ss = jnp.sum(v * v, axis=-1, keepdims=True)
    return v * lax.rsqrt(jnp.maximum(ss, EPS_NORM * EPS_NORM))


def _mm(a, b):
    """MXU matmul with bf16 operands, f32 accumulation."""
    return jnp.dot(a.astype(jnp.bfloat16), b.astype(jnp.bfloat16),
                   preferred_element_type=jnp.float32)


# ----------------------------------------------------------------------------------
# Pallas kernel: full forward pass in a single invocation (everything fits in VMEM).
# ----------------------------------------------------------------------------------
def _normalized_transformer_kernel(
    x_ref,        # (B, INPUT_DIM)        f32
    w_ref,        # (W_TOTAL, 128)        bf16: all matmul weights, pre-transposed
    c_ref,        # (C_TOTAL, 128)        f32 : biases / LN affine / pe / mask / avg
    alphas_ref,   # (2, L) in SMEM        f32 : [alphaA; alphaM]
    out_ref,      # (B, 128)              f32 : lane-dense; cols 0:OUTPUT_DIM are real
):
    H, P, NH, hd = HIDDEN, PROJ, NUM_HEADS, HEAD_DIM

    # precomputed constants (single DMA'd slab; static ref slices are free views)
    pca_b = c_ref[C_PCA_B:C_PCA_B + 1, 0:H]
    vg_b = c_ref[C_VG_B:C_VG_B + 1, 0:P * H]
    ln_g = c_ref[C_LN_G:C_LN_G + 1, 0:P * H]
    ln_b = c_ref[C_LN_B:C_LN_B + 1, 0:P * H]
    reg_b = c_ref[C_REG_B:C_REG_B + 1, :]            # (1, 128)
    pe = c_ref[C_PE:C_PE + BP, 0:H]                  # (8, 32) pe already tiled by batch
    attn_mask = c_ref[C_MASK:C_MASK + HB, 0:HB]      # (32, 32) additive block-diag mask
    avg = c_ref[C_AVG:C_AVG + BATCH, 0:BP]           # (2, 8)  per-batch mean-over-views

    # ---- stem: pca_projection -> l2 norm -> view_generator (Linear + LayerNorm) ----
    t = _mm(x_ref[...], w_ref[W_PCA:W_PCA + INPUT_DIM, 0:H]) + pca_b       # (B, H)
    t = _l2norm(t)
    v = _mm(t, w_ref[W_VG:W_VG + H, 0:P * H]) + vg_b                       # (B, P*H)
    mu = jnp.mean(v, axis=-1, keepdims=True)
    var = jnp.mean((v - mu) * (v - mu), axis=-1, keepdims=True)
    v = (v - mu) * lax.rsqrt(var + EPS_LN) * ln_g + ln_b                   # (B, P*H)

    # (B, P*H) -> (B*P, H) in registers (slice + sublane concat; no VMEM scratch)
    views = [v[b:b + 1, p * H:(p + 1) * H] for b in range(BATCH) for p in range(P)]
    xv = jnp.concatenate(views, axis=0)                                    # (B*P, H)
    x = _l2norm(xv) + pe                                                   # + positional enc.

    # ---- NormalizedTransformerBlock stack ----
    for l in range(NUM_LAYERS):
        wl = W_LAYER + l * W_ROWS_PER_LAYER
        cl = C_LAYER + l * C_ROWS_PER_LAYER
        bqkv = c_ref[cl + 0:cl + 1, 0:3 * H]
        bo = c_ref[cl + 1:cl + 2, 0:H]
        b1 = c_ref[cl + 2:cl + 3, 0:MLP_HIDDEN]
        b2 = c_ref[cl + 3:cl + 4, 0:H]
        a_attn = alphas_ref[0, l]
        a_mlp = alphas_ref[1, l]

        x = _l2norm(x)

        # fused QKV projection over the whole (B*P, H) slab
        qkv = _mm(x, w_ref[wl + W_QKV_OFF:wl + W_QKV_OFF + H, 0:3 * H]) + bqkv   # (B*P, 3H)

        # relayout lane-blocked heads -> head-stacked (NH*B*P, hd) once per layer
        def stack_heads(off):
            return jnp.concatenate(
                [qkv[:, off + h * hd: off + (h + 1) * hd] for h in range(NH)], axis=0)

        qh = stack_heads(0)            # (32, 8)
        kh = stack_heads(H)            # (32, 8)
        vh = stack_heads(2 * H)        # (32, 8)

        # single masked (32,32) attention: one score matmul, one softmax, one AV matmul
        s = lax.dot_general(qh.astype(jnp.bfloat16), kh.astype(jnp.bfloat16),
                            (((1,), (1,)), ((), ())),
                            preferred_element_type=jnp.float32)                  # (32, 32)
        s = s * ATTN_SCALE + attn_mask
        s = s - jnp.max(s, axis=-1, keepdims=True)
        e = jnp.exp(s)
        attn = e * pl.reciprocal(jnp.sum(e, axis=-1, keepdims=True), approx=True)
        av = _mm(attn, vh)                                                       # (32, 8)

        # head-stacked -> (B*P, H): concatenate heads back along lanes
        o = jnp.concatenate([av[h * BP:(h + 1) * BP, :] for h in range(NH)], axis=-1)

        h_attn = _l2norm(_mm(o, w_ref[wl + W_WO_OFF:wl + W_WO_OFF + H, 0:H]) + bo)
        x = _l2norm(x + a_attn * (h_attn - x))

        # MLP: Linear -> ReLU -> Linear
        h1 = jnp.maximum(
            _mm(x, w_ref[wl + W_W1_OFF:wl + W_W1_OFF + H, 0:MLP_HIDDEN]) + b1, 0.0)
        hm = _l2norm(
            _mm(h1, w_ref[wl + W_W2_OFF:wl + W_W2_OFF + MLP_HIDDEN, 0:H]) + b2)
        x = _l2norm(x + a_mlp * (hm - x))

    # ---- head: per-batch mean over views (one matmul) + regression (one matmul) ----
    xm = _mm(avg, x)                                              # (B, H)
    # regression weights are zero-padded to 128 lanes -> lane-dense unmasked store
    out_ref[...] = _mm(xm, w_ref[W_REG:W_REG + H, :]) + reg_b     # (B, 128)


# ----------------------------------------------------------------------------------
# Wrapper / parameter handling (plain-JAX glue)
# ----------------------------------------------------------------------------------
def normalized_transformer_pallas(x, packed_args):
    w_slab, c_slab, alphas = packed_args
    out = pl.pallas_call(
        _normalized_transformer_kernel,
        out_shape=jax.ShapeDtypeStruct((BATCH, LANES), jnp.float32),
        in_specs=[
            pl.BlockSpec(memory_space=pltpu.MemorySpace.VMEM),   # x
            pl.BlockSpec(memory_space=pltpu.MemorySpace.VMEM),   # weight slab (bf16)
            pl.BlockSpec(memory_space=pltpu.MemorySpace.VMEM),   # constant slab (f32)
            pl.BlockSpec(memory_space=pltpu.MemorySpace.SMEM),   # alphas
        ],
        out_specs=pl.BlockSpec(memory_space=pltpu.MemorySpace.VMEM),
    )(x, w_slab, c_slab, alphas)
    return out[:, :OUTPUT_DIM]


def make_positional_encoding(max_len, d_model):
    position = jnp.arange(max_len, dtype=jnp.float32)[:, None]
    div_term = jnp.exp(
        jnp.arange(0, d_model, 2, dtype=jnp.float32) * (-math.log(10000.0) / d_model)
    )
    pe = jnp.zeros((max_len, d_model), jnp.float32)
    pe = pe.at[:, 0::2].set(jnp.sin(position * div_term))
    pe = pe.at[:, 1::2].set(jnp.cos(position * div_term))
    return pe


def init_params(key):
    """Deterministic parameter init in PyTorch (out_features, in_features) layout."""
    keys = iter(jax.random.split(key, 64))

    def nxt():
        return next(keys)

    def lin_w(k, out_d, in_d):
        bound = 1.0 / math.sqrt(in_d)
        return jax.random.uniform(k, (out_d, in_d), jnp.float32, -bound, bound)

    def lin_b(k, out_d, in_d):
        bound = 1.0 / math.sqrt(in_d)
        return jax.random.uniform(k, (out_d,), jnp.float32, -bound, bound)

    L, H = NUM_LAYERS, HIDDEN
    p = {}
    p["pca_w"] = lin_w(nxt(), H, INPUT_DIM)
    p["pca_b"] = lin_b(nxt(), H, INPUT_DIM)
    p["vg_w"] = lin_w(nxt(), PROJ * H, H)
    p["vg_b"] = lin_b(nxt(), PROJ * H, H)
    p["ln_g"] = jnp.ones((PROJ * H,), jnp.float32)
    p["ln_b"] = jnp.zeros((PROJ * H,), jnp.float32)
    p["pe"] = make_positional_encoding(PROJ, H)
    p["in_proj_w"] = jnp.stack([lin_w(nxt(), 3 * H, H) for _ in range(L)])
    p["in_proj_b"] = jnp.stack([lin_b(nxt(), 3 * H, H) for _ in range(L)])
    p["out_proj_w"] = jnp.stack([lin_w(nxt(), H, H) for _ in range(L)])
    p["out_proj_b"] = jnp.stack([lin_b(nxt(), H, H) for _ in range(L)])
    p["w1"] = jnp.stack([lin_w(nxt(), MLP_HIDDEN, H) for _ in range(L)])
    p["b1"] = jnp.stack([lin_b(nxt(), MLP_HIDDEN, H) for _ in range(L)])
    p["w2"] = jnp.stack([lin_w(nxt(), H, MLP_HIDDEN) for _ in range(L)])
    p["b2"] = jnp.stack([lin_b(nxt(), H, MLP_HIDDEN) for _ in range(L)])
    p["alphaA"] = jnp.ones((L,), jnp.float32)
    p["alphaM"] = jnp.ones((L,), jnp.float32)
    p["reg_w"] = lin_w(nxt(), OUTPUT_DIM, H)
    p["reg_b"] = lin_b(nxt(), OUTPUT_DIM, H)
    return p


def pack_params(p):
    """Repack PyTorch-layout params into 2 lane-dense slabs + SMEM alphas (3 arrays)."""
    L, H, P = NUM_LAYERS, HIDDEN, PROJ

    # ---- bf16 weight slab: all matmul RHS operands, pre-transposed to (in, out) ----
    w = jnp.zeros((W_TOTAL, LANES), jnp.float32)
    w = w.at[W_PCA:W_PCA + INPUT_DIM, 0:H].set(p["pca_w"].T)
    w = w.at[W_VG:W_VG + H, 0:P * H].set(p["vg_w"].T)
    w = w.at[W_REG:W_REG + H, 0:OUTPUT_DIM].set(p["reg_w"].T)   # lanes >= OUT stay zero
    for l in range(L):
        base = W_LAYER + l * W_ROWS_PER_LAYER
        w = w.at[base + W_QKV_OFF:base + W_QKV_OFF + H, 0:3 * H].set(p["in_proj_w"][l].T)
        w = w.at[base + W_WO_OFF:base + W_WO_OFF + H, 0:H].set(p["out_proj_w"][l].T)
        w = w.at[base + W_W1_OFF:base + W_W1_OFF + H, 0:MLP_HIDDEN].set(p["w1"][l].T)
        w = w.at[base + W_W2_OFF:base + W_W2_OFF + MLP_HIDDEN, 0:H].set(p["w2"][l].T)
    w = w.astype(jnp.bfloat16)

    # ---- f32 constant slab: biases, LN affine, tiled pe, attention mask, avg matrix ----
    c = jnp.zeros((C_TOTAL, LANES), jnp.float32)
    c = c.at[C_PCA_B, 0:H].set(p["pca_b"])
    c = c.at[C_VG_B, 0:P * H].set(p["vg_b"])
    c = c.at[C_LN_G, 0:P * H].set(p["ln_g"])
    c = c.at[C_LN_B, 0:P * H].set(p["ln_b"])
    c = c.at[C_REG_B, 0:OUTPUT_DIM].set(p["reg_b"])
    c = c.at[C_PE:C_PE + BP, 0:H].set(jnp.tile(p["pe"], (BATCH, 1)))
    # block-diagonal additive mask over (head, batch): row = h*BP + b*P + i  ->  group = row // P
    grp = jnp.arange(HB) // P
    mask32 = jnp.where(grp[:, None] == grp[None, :], 0.0, NEG_INF).astype(jnp.float32)
    c = c.at[C_MASK:C_MASK + HB, 0:HB].set(mask32)
    # per-batch mean-over-views matrix (B, B*P)
    rb = jnp.arange(BATCH)[:, None]
    cb = (jnp.arange(BP) // P)[None, :]
    avg = jnp.where(rb == cb, 1.0 / P, 0.0).astype(jnp.float32)
    c = c.at[C_AVG:C_AVG + BATCH, 0:BP].set(avg)
    for l in range(L):
        base = C_LAYER + l * C_ROWS_PER_LAYER
        c = c.at[base + 0, 0:3 * H].set(p["in_proj_b"][l])
        c = c.at[base + 1, 0:H].set(p["out_proj_b"][l])
        c = c.at[base + 2, 0:MLP_HIDDEN].set(p["b1"][l])
        c = c.at[base + 3, 0:H].set(p["b2"][l])

    alphas = jnp.stack([p["alphaA"], p["alphaM"]], axis=0)      # (2, L) -> SMEM
    return [w, c, alphas]


# ----------------------------------------------------------------------------------
# Pure-JAX reference (mirrors the PyTorch forward), used only as a sanity check.
# ----------------------------------------------------------------------------------
def _l2norm_ref(v):
    n = jnp.sqrt(jnp.sum(v * v, axis=-1, keepdims=True))
    return v / jnp.maximum(n, EPS_NORM)


def reference_forward(x, p):
    with jax.default_matmul_precision("float32"):
        t = x @ p["pca_w"].T + p["pca_b"]
        t = _l2norm_ref(t)
        v = t @ p["vg_w"].T + p["vg_b"]
        mu = v.mean(-1, keepdims=True)
        var = ((v - mu) ** 2).mean(-1, keepdims=True)
        v = (v - mu) / jnp.sqrt(var + EPS_LN) * p["ln_g"] + p["ln_b"]
        xx = v.reshape(BATCH, PROJ, HIDDEN)
        xx = _l2norm_ref(xx) + p["pe"][None]
        for l in range(NUM_LAYERS):
            xx = _l2norm_ref(xx)
            qkv = xx @ p["in_proj_w"][l].T + p["in_proj_b"][l]
            q, k, vv = jnp.split(qkv, 3, axis=-1)

            def sp(a):
                return a.reshape(BATCH, PROJ, NUM_HEADS, HEAD_DIM).transpose(0, 2, 1, 3)

            q, k, vv = sp(q), sp(k), sp(vv)
            s = jnp.einsum("bhqd,bhkd->bhqk", q, k) * ATTN_SCALE
            a = jax.nn.softmax(s, axis=-1)
            o = jnp.einsum("bhqk,bhkd->bhqd", a, vv)
            o = o.transpose(0, 2, 1, 3).reshape(BATCH, PROJ, HIDDEN)
            hA = o @ p["out_proj_w"][l].T + p["out_proj_b"][l]
            hA = _l2norm_ref(hA)
            xx = _l2norm_ref(xx + p["alphaA"][l] * (hA - xx))
            h1 = jax.nn.relu(xx @ p["w1"][l].T + p["b1"][l])
            hM = h1 @ p["w2"][l].T + p["b2"][l]
            hM = _l2norm_ref(hM)
            xx = _l2norm_ref(xx + p["alphaM"][l] * (hM - xx))
        xm = xx.mean(axis=1)
        return xm @ p["reg_w"].T + p["reg_b"]


if __name__ == "__main__":
    key = jax.random.PRNGKey(0)
    pkey, xkey = jax.random.split(key)
    params = init_params(pkey)
    packed = pack_params(params)

    x = jax.random.normal(xkey, (BATCH, INPUT_DIM), jnp.float32)

    out = jax.block_until_ready(normalized_transformer_pallas(x, packed))
    ref = jax.block_until_ready(reference_forward(x, params))

    assert out.shape == (BATCH, OUTPUT_DIM), out.shape
    assert bool(jnp.all(jnp.isfinite(out)))
    # tolerance covers bf16 MXU operands (elementwise / norm math kept in f32)
    assert bool(jnp.allclose(out, ref, rtol=2e-2, atol=2e-2)), (out, ref)

    print("KERNEL_OK")
</pallas_src>

<mosaic_0001>
module attributes {stable_mosaic.version = 11 : i64} {
  func.func @_normalized_transformer_kernel(%arg0: memref<2x16xf32, #tpu.memory_space<vmem>>, %arg1: memref<400x128xbf16, #tpu.memory_space<vmem>>, %arg2: memref<72x128xf32, #tpu.memory_space<vmem>>, %arg3: memref<2x2xf32, #tpu.memory_space<smem>>, %arg4: memref<2x128xf32, #tpu.memory_space<vmem>>) attributes {dimension_semantics = [], scalar_prefetch = 0 : i64, scratch_operands = 0 : i64, tpu.core_type = #tpu.core_type<tc>} {
    %c0 = arith.constant 0 : index
    %c0_0 = arith.constant 0 : index
    %0 = vector.load %arg2[%c0, %c0_0] : memref<72x128xf32, #tpu.memory_space<vmem>>, vector<1x32xf32>
    %c1 = arith.constant 1 : index
    %c0_1 = arith.constant 0 : index
    %1 = vector.load %arg2[%c1, %c0_1] : memref<72x128xf32, #tpu.memory_space<vmem>>, vector<1x128xf32>
    %c2 = arith.constant 2 : index
    %c0_2 = arith.constant 0 : index
    %2 = vector.load %arg2[%c2, %c0_2] : memref<72x128xf32, #tpu.memory_space<vmem>>, vector<1x128xf32>
    %c3 = arith.constant 3 : index
    %c0_3 = arith.constant 0 : index
    %3 = vector.load %arg2[%c3, %c0_3] : memref<72x128xf32, #tpu.memory_space<vmem>>, vector<1x128xf32>
    %c4 = arith.constant 4 : index
    %c0_4 = arith.constant 0 : index
    %4 = vector.load %arg2[%c4, %c0_4] : memref<72x128xf32, #tpu.memory_space<vmem>>, vector<1x128xf32>
    %c8 = arith.constant 8 : index
    %c0_5 = arith.constant 0 : index
    %5 = vector.load %arg2[%c8, %c0_5] : memref<72x128xf32, #tpu.memory_space<vmem>>, vector<8x32xf32>
    %c16 = arith.constant 16 : index
    %c0_6 = arith.constant 0 : index
    %6 = vector.load %arg2[%c16, %c0_6] : memref<72x128xf32, #tpu.memory_space<vmem>>, vector<32x32xf32>
    %c48 = arith.constant 48 : index
    %c0_7 = arith.constant 0 : index
    %7 = vector.load %arg2[%c48, %c0_7] : memref<72x128xf32, #tpu.memory_space<vmem>>, vector<2x8xf32>
    %c0_8 = arith.constant 0 : index
    %c0_9 = arith.constant 0 : index
    %8 = vector.load %arg0[%c0_8, %c0_9] : memref<2x16xf32, #tpu.memory_space<vmem>>, vector<2x16xf32>
    %c0_10 = arith.constant 0 : index
    %c0_11 = arith.constant 0 : index
    %9 = vector.load %arg1[%c0_10, %c0_11] : memref<400x128xbf16, #tpu.memory_space<vmem>>, vector<16x32xbf16>
    %10 = arith.truncf %8 : vector<2x16xf32> to vector<2x16xbf16>
    %cst = arith.constant dense<0.000000e+00> : vector<2x32xf32>
    %11 = tpu.matmul %10, %9, %cst {dimension_numbers = #tpu.dot_dimension_numbers<[1], [0], [0], [1], [0, 0, 1, 1], [], []>} : vector<2x16xbf16>, vector<16x32xbf16>, vector<2x32xf32> -> vector<2x32xf32>
    %12 = vector.broadcast %0 : vector<1x32xf32> to vector<2x32xf32>
    %13 = arith.addf %11, %12 : vector<2x32xf32>
    %14 = arith.mulf %13, %13 : vector<2x32xf32>
    %cst_12 = arith.constant dense<0.000000e+00> : vector<2xf32>
    %15 = vector.multi_reduction <add>, %14, %cst_12 [1] : vector<2x32xf32> to vector<2xf32>
    %16 = vector.shape_cast %15 : vector<2xf32> to vector<2x1xf32>
    %cst_13 = arith.constant 1.000000e-24 : f32
    %17 = vector.broadcast %cst_13 : f32 to vector<2x1xf32>
    %18 = arith.maximumf %16, %17 : vector<2x1xf32>
    %19 = math.rsqrt %18 : vector<2x1xf32>
    %20 = vector.broadcast %19 : vector<2x1xf32> to vector<2x32xf32>
    %21 = arith.mulf %13, %20 : vector<2x32xf32>
    %c16_14 = arith.constant 16 : index
    %c0_15 = arith.constant 0 : index
    %22 = vector.load %arg1[%c16_14, %c0_15] : memref<400x128xbf16, #tpu.memory_space<vmem>>, vector<32x128xbf16>
    %23 = arith.truncf %21 : vector<2x32xf32> to vector<2x32xbf16>
    %cst_16 = arith.constant dense<0.000000e+00> : vector<2x128xf32>
    %24 = tpu.matmul %23, %22, %cst_16 {dimension_numbers = #tpu.dot_dimension_numbers<[1], [0], [0], [1], [0, 0, 1, 1], [], []>} : vector<2x32xbf16>, vector<32x128xbf16>, vector<2x128xf32> -> vector<2x128xf32>
    %25 = vector.broadcast %1 : vector<1x128xf32> to vector<2x128xf32>
    %26 = arith.addf %24, %25 : vector<2x128xf32>
    %cst_17 = arith.constant dense<0.000000e+00> : vector<2xf32>
    %27 = vector.multi_reduction <add>, %26, %cst_17 [1] : vector<2x128xf32> to vector<2xf32>
    %28 = vector.shape_cast %27 : vector<2xf32> to vector<2x1xf32>
    %cst_18 = arith.constant 1.280000e+02 : f32
    %29 = vector.broadcast %cst_18 : f32 to vector<2x1xf32>
    %30 = arith.divf %28, %29 : vector<2x1xf32>
    %31 = vector.broadcast %30 : vector<2x1xf32> to vector<2x128xf32>
    %32 = arith.subf %26, %31 : vector<2x128xf32>
    %33 = vector.broadcast %30 : vector<2x1xf32> to vector<2x128xf32>
    %34 = arith.subf %26, %33 : vector<2x128xf32>
    %35 = arith.mulf %32, %34 : vector<2x128xf32>
    %cst_19 = arith.constant dense<0.000000e+00> : vector<2xf32>
    %36 = vector.multi_reduction <add>, %35, %cst_19 [1] : vector<2x128xf32> to vector<2xf32>
    %37 = vector.shape_cast %36 : vector<2xf32> to vector<2x1xf32>
    %cst_20 = arith.constant 1.280000e+02 : f32
    %38 = vector.broadcast %cst_20 : f32 to vector<2x1xf32>
    %39 = arith.divf %37, %38 : vector<2x1xf32>
    %40 = vector.broadcast %30 : vector<2x1xf32> to vector<2x128xf32>
    %41 = arith.subf %26, %40 : vector<2x128xf32>
    %cst_21 = arith.constant 9.99999974E-6 : f32
    %42 = vector.broadcast %cst_21 : f32 to vector<2x1xf32>
    %43 = arith.addf %39, %42 : vector<2x1xf32>
    %44 = math.rsqrt %43 : vector<2x1xf32>
    %45 = vector.broadcast %44 : vector<2x1xf32> to vector<2x128xf32>
    %46 = arith.mulf %41, %45 : vector<2x128xf32>
    %47 = vector.broadcast %2 : vector<1x128xf32> to vector<2x128xf32>
    %48 = arith.mulf %46, %47 : vector<2x128xf32>
    %49 = vector.broadcast %3 : vector<1x128xf32> to vector<2x128xf32>
    %50 = arith.addf %48, %49 : vector<2x128xf32>
    %51 = vector.extract_strided_slice %50 {offsets = [0, 0], sizes = [1, 32], strides = [1, 1]} : vector<2x128xf32> to vector<1x32xf32>
    %52 = vector.extract_strided_slice %50 {offsets = [0, 32], sizes = [1, 32], strides = [1, 1]} : vector<2x128xf32> to vector<1x32xf32>
    %53 = vector.extract_strided_slice %50 {offsets = [0, 64], sizes = [1, 32], strides = [1, 1]} : vector<2x128xf32> to vector<1x32xf32>
    %54 = vector.extract_strided_slice %50 {offsets = [0, 96], sizes = [1, 32], strides = [1, 1]} : vector<2x128xf32> to vector<1x32xf32>
    %55 = vector.extract_strided_slice %50 {offsets = [1, 0], sizes = [1, 32], strides = [1, 1]} : vector<2x128xf32> to vector<1x32xf32>
    %56 = vector.extract_strided_slice %50 {offsets = [1, 32], sizes = [1, 32], strides = [1, 1]} : vector<2x128xf32> to vector<1x32xf32>
    %57 = vector.extract_strided_slice %50 {offsets = [1, 64], sizes = [1, 32], strides = [1, 1]} : vector<2x128xf32> to vector<1x32xf32>
    %58 = vector.extract_strided_slice %50 {offsets = [1, 96], sizes = [1, 32], strides = [1, 1]} : vector<2x128xf32> to vector<1x32xf32>
    %59 = tpu.concatenate %51, %52, %53, %54, %55, %56, %57, %58 in 0 : vector<1x32xf32>, vector<1x32xf32>, vector<1x32xf32>, vector<1x32xf32>, vector<1x32xf32>, vector<1x32xf32>, vector<1x32xf32>, vector<1x32xf32> -> vector<8x32xf32>
    %60 = arith.mulf %59, %59 : vector<8x32xf32>
    %cst_22 = arith.constant dense<0.000000e+00> : vector<8xf32>
    %61 = vector.multi_reduction <add>, %60, %cst_22 [1] : vector<8x32xf32> to vector<8xf32>
    %62 = vector.shape_cast %61 : vector<8xf32> to vector<8x1xf32>
    %cst_23 = arith.constant 1.000000e-24 : f32
    %63 = vector.broadcast %cst_23 : f32 to vector<8x1xf32>
    %64 = arith.maximumf %62, %63 : vector<8x1xf32>
    %65 = math.rsqrt %64 : vector<8x1xf32>
    %66 = vector.broadcast %65 : vector<8x1xf32> to vector<8x32xf32>
    %67 = arith.mulf %59, %66 : vector<8x32xf32>
    %68 = arith.addf %67, %5 : vector<8x32xf32>
    %c56 = arith.constant 56 : index
    %c0_24 = arith.constant 0 : index
    %69 = vector.load %arg2[%c56, %c0_24] : memref<72x128xf32, #tpu.memory_space<vmem>>, vector<1x96xf32>
    %c57 = arith.constant 57 : index
    %c0_25 = arith.constant 0 : index
    %70 = vector.load %arg2[%c57, %c0_25] : memref<72x128xf32, #tpu.memory_space<vmem>>, vector<1x32xf32>
    %c58 = arith.constant 58 : index
    %c0_26 = arith.constant 0 : index
    %71 = vector.load %arg2[%c58, %c0_26] : memref<72x128xf32, #tpu.memory_space<vmem>>, vector<1x64xf32>
    %c59 = arith.constant 59 : index
    %c0_27 = arith.constant 0 : index
    %72 = vector.load %arg2[%c59, %c0_27] : memref<72x128xf32, #tpu.memory_space<vmem>>, vector<1x32xf32>
    %c0_28 = arith.constant 0 : index
    %c0_29 = arith.constant 0 : index
    %73 = memref.load %arg3[%c0_28, %c0_29] : memref<2x2xf32, #tpu.memory_space<smem>>
    %c1_30 = arith.constant 1 : index
    %c0_31 = arith.constant 0 : index
    %74 = memref.load %arg3[%c1_30, %c0_31] : memref<2x2xf32, #tpu.memory_space<smem>>
    %75 = arith.mulf %68, %68 : vector<8x32xf32>
    %cst_32 = arith.constant dense<0.000000e+00> : vector<8xf32>
    %76 = vector.multi_reduction <add>, %75, %cst_32 [1] : vector<8x32xf32> to vector<8xf32>
    %77 = vector.shape_cast %76 : vector<8xf32> to vector<8x1xf32>
    %cst_33 = arith.constant 1.000000e-24 : f32
    %78 = vector.broadcast %cst_33 : f32 to vector<8x1xf32>
    %79 = arith.maximumf %77, %78 : vector<8x1xf32>
    %80 = math.rsqrt %79 : vector<8x1xf32>
    %81 = vector.broadcast %80 : vector<8x1xf32> to vector<8x32xf32>
    %82 = arith.mulf %68, %81 : vector<8x32xf32>
    %c80 = arith.constant 80 : index
    %c0_34 = arith.constant 0 : index
    %83 = vector.load %arg1[%c80, %c0_34] : memref<400x128xbf16, #tpu.memory_space<vmem>>, vector<32x96xbf16>
    %84 = arith.truncf %82 : vector<8x32xf32> to vector<8x32xbf16>
    %cst_35 = arith.constant dense<0.000000e+00> : vector<8x96xf32>
    %85 = tpu.matmul %84, %83, %cst_35 {dimension_numbers = #tpu.dot_dimension_numbers<[1], [0], [0], [1], [0, 0, 1, 1], [], []>} : vector<8x32xbf16>, vector<32x96xbf16>, vector<8x96xf32> -> vector<8x96xf32>
    %86 = vector.broadcast %69 : vector<1x96xf32> to vector<8x96xf32>
    %87 = arith.addf %85, %86 : vector<8x96xf32>
    %88 = vector.extract_strided_slice %87 {offsets = [0, 0], sizes = [8, 8], strides = [1, 1]} : vector<8x96xf32> to vector<8x8xf32>
    %89 = vector.extract_strided_slice %87 {offsets = [0, 8], sizes = [8, 8], strides = [1, 1]} : vector<8x96xf32> to vector<8x8xf32>
    %90 = vector.extract_strided_slice %87 {offsets = [0, 16], sizes = [8, 8], strides = [1, 1]} : vector<8x96xf32> to vector<8x8xf32>
    %91 = vector.extract_strided_slice %87 {offsets = [0, 24], sizes = [8, 8], strides = [1, 1]} : vector<8x96xf32> to vector<8x8xf32>
    %92 = tpu.concatenate %88, %89, %90, %91 in 0 : vector<8x8xf32>, vector<8x8xf32>, vector<8x8xf32>, vector<8x8xf32> -> vector<32x8xf32>
    %93 = vector.extract_strided_slice %87 {offsets = [0, 32], sizes = [8, 8], strides = [1, 1]} : vector<8x96xf32> to vector<8x8xf32>
    %94 = vector.extract_strided_slice %87 {offsets = [0, 40], sizes = [8, 8], strides = [1, 1]} : vector<8x96xf32> to vector<8x8xf32>
    %95 = vector.extract_strided_slice %87 {offsets = [0, 48], sizes = [8, 8], strides = [1, 1]} : vector<8x96xf32> to vector<8x8xf32>
    %96 = vector.extract_strided_slice %87 {offsets = [0, 56], sizes = [8, 8], strides = [1, 1]} : vector<8x96xf32> to vector<8x8xf32>
    %97 = tpu.concatenate %93, %94, %95, %96 in 0 : vector<8x8xf32>, vector<8x8xf32>, vector<8x8xf32>, vector<8x8xf32> -> vector<32x8xf32>
    %98 = vector.extract_strided_slice %87 {offsets = [0, 64], sizes = [8, 8], strides = [1, 1]} : vector<8x96xf32> to vector<8x8xf32>
    %99 = vector.extract_strided_slice %87 {offsets = [0, 72], sizes = [8, 8], strides = [1, 1]} : vector<8x96xf32> to vector<8x8xf32>
    %100 = vector.extract_strided_slice %87 {offsets = [0, 80], sizes = [8, 8], strides = [1, 1]} : vector<8x96xf32> to vector<8x8xf32>
    %101 = vector.extract_strided_slice %87 {offsets = [0, 88], sizes = [8, 8], strides = [1, 1]} : vector<8x96xf32> to vector<8x8xf32>
    %102 = tpu.concatenate %98, %99, %100, %101 in 0 : vector<8x8xf32>, vector<8x8xf32>, vector<8x8xf32>, vector<8x8xf32> -> vector<32x8xf32>
    %103 = arith.truncf %92 : vector<32x8xf32> to vector<32x8xbf16>
    %104 = arith.truncf %97 : vector<32x8xf32> to vector<32x8xbf16>
    %cst_36 = arith.constant dense<0.000000e+00> : vector<32x32xf32>
    %105 = tpu.matmul %103, %104, %cst_36 {dimension_numbers = #tpu.dot_dimension_numbers<[1], [1], [0], [0], [0, 0, 1, 0], [], []>} : vector<32x8xbf16>, vector<32x8xbf16>, vector<32x32xf32> -> vector<32x32xf32>
    %cst_37 = arith.constant 0.353553385 : f32
    %106 = vector.broadcast %cst_37 : f32 to vector<32x32xf32>
    %107 = arith.mulf %105, %106 : vector<32x32xf32>
    %108 = arith.addf %107, %6 : vector<32x32xf32>
    %cst_38 = arith.constant dense<0xFF800000> : vector<32xf32>
    %109 = vector.multi_reduction <maximumf>, %108, %cst_38 [1] : vector<32x32xf32> to vector<32xf32>
    %110 = vector.shape_cast %109 : vector<32xf32> to vector<32x1xf32>
    %111 = vector.broadcast %110 : vector<32x1xf32> to vector<32x32xf32>
    %112 = arith.subf %108, %111 : vector<32x32xf32>
    %113 = math.exp %112 : vector<32x32xf32>
    %cst_39 = arith.constant dense<0.000000e+00> : vector<32xf32>
    %114 = vector.multi_reduction <add>, %113, %cst_39 [1] : vector<32x32xf32> to vector<32xf32>
    %115 = vector.shape_cast %114 : vector<32xf32> to vector<32x1xf32>
    %116 = tpu.reciprocal %115 {approx = true} : vector<32x1xf32> -> vector<32x1xf32>
    %117 = vector.broadcast %116 : vector<32x1xf32> to vector<32x32xf32>
    %118 = arith.mulf %113, %117 : vector<32x32xf32>
    %119 = arith.truncf %118 : vector<32x32xf32> to vector<32x32xbf16>
    %120 = arith.truncf %102 : vector<32x8xf32> to vector<32x8xbf16>
    %cst_40 = arith.constant dense<0.000000e+00> : vector<32x8xf32>
    %121 = tpu.matmul %119, %120, %cst_40 {dimension_numbers = #tpu.dot_dimension_numbers<[1], [0], [0], [1], [0, 0, 1, 1], [], []>} : vector<32x32xbf16>, vector<32x8xbf16>, vector<32x8xf32> -> vector<32x8xf32>
    %122 = vector.extract_strided_slice %121 {offsets = [0, 0], sizes = [8, 8], strides = [1, 1]} : vector<32x8xf32> to vector<8x8xf32>
    %123 = vector.extract_strided_slice %121 {offsets = [8, 0], sizes = [8, 8], strides = [1, 1]} : vector<32x8xf32> to vector<8x8xf32>
    %124 = vector.extract_strided_slice %121 {offsets = [16, 0], sizes = [8, 8], strides = [1, 1]} : vector<32x8xf32> to vector<8x8xf32>
    %125 = vector.extract_strided_slice %121 {offsets = [24, 0], sizes = [8, 8], strides = [1, 1]} : vector<32x8xf32> to vector<8x8xf32>
    %126 = tpu.concatenate %122, %123, %124, %125 in 1 : vector<8x8xf32>, vector<8x8xf32>, vector<8x8xf32>, vector<8x8xf32> -> vector<8x32xf32>
    %c112 = arith.constant 112 : index
    %c0_41 = arith.constant 0 : index
    %127 = vector.load %arg1[%c112, %c0_41] : memref<400x128xbf16, #tpu.memory_space<vmem>>, vector<32x32xbf16>
    %128 = arith.truncf %126 : vector<8x32xf32> to vector<8x32xbf16>
    %cst_42 = arith.constant dense<0.000000e+00> : vector<8x32xf32>
    %129 = tpu.matmul %128, %127, %cst_42 {dimension_numbers = #tpu.dot_dimension_numbers<[1], [0], [0], [1], [0, 0, 1, 1], [], []>} : vector<8x32xbf16>, vector<32x32xbf16>, vector<8x32xf32> -> vector<8x32xf32>
    %130 = vector.broadcast %70 : vector<1x32xf32> to vector<8x32xf32>
    %131 = arith.addf %129, %130 : vector<8x32xf32>
    %132 = arith.mulf %131, %131 : vector<8x32xf32>
    %cst_43 = arith.constant dense<0.000000e+00> : vector<8xf32>
    %133 = vector.multi_reduction <add>, %132, %cst_43 [1] : vector<8x32xf32> to vector<8xf32>
    %134 = vector.shape_cast %133 : vector<8xf32> to vector<8x1xf32>
    %cst_44 = arith.constant 1.000000e-24 : f32
    %135 = vector.broadcast %cst_44 : f32 to vector<8x1xf32>
    %136 = arith.maximumf %134, %135 : vector<8x1xf32>
    %137 = math.rsqrt %136 : vector<8x1xf32>
    %138 = vector.broadcast %137 : vector<8x1xf32> to vector<8x32xf32>
    %139 = arith.mulf %131, %138 : vector<8x32xf32>
    %140 = arith.subf %139, %82 : vector<8x32xf32>
    %141 = vector.broadcast %73 : f32 to vector<8x32xf32>
    %142 = arith.mulf %141, %140 : vector<8x32xf32>
    %143 = arith.addf %82, %142 : vector<8x32xf32>
    %144 = arith.mulf %143, %143 : vector<8x32xf32>
    %cst_45 = arith.constant dense<0.000000e+00> : vector<8xf32>
    %145 = vector.multi_reduction <add>, %144, %cst_45 [1] : vector<8x32xf32> to vector<8xf32>
    %146 = vector.shape_cast %145 : vector<8xf32> to vector<8x1xf32>
    %cst_46 = arith.constant 1.000000e-24 : f32
    %147 = vector.broadcast %cst_46 : f32 to vector<8x1xf32>
    %148 = arith.maximumf %146, %147 : vector<8x1xf32>
    %149 = math.rsqrt %148 : vector<8x1xf32>
    %150 = vector.broadcast %149 : vector<8x1xf32> to vector<8x32xf32>
    %151 = arith.mulf %143, %150 : vector<8x32xf32>
    %c144 = arith.constant 144 : index
    %c0_47 = arith.constant 0 : index
    %152 = vector.load %arg1[%c144, %c0_47] : memref<400x128xbf16, #tpu.memory_space<vmem>>, vector<32x64xbf16>
    %153 = arith.truncf %151 : vector<8x32xf32> to vector<8x32xbf16>
    %cst_48 = arith.constant dense<0.000000e+00> : vector<8x64xf32>
    %154 = tpu.matmul %153, %152, %cst_48 {dimension_numbers = #tpu.dot_dimension_numbers<[1], [0], [0], [1], [0, 0, 1, 1], [], []>} : vector<8x32xbf16>, vector<32x64xbf16>, vector<8x64xf32> -> vector<8x64xf32>
    %155 = vector.broadcast %71 : vector<1x64xf32> to vector<8x64xf32>
    %156 = arith.addf %154, %155 : vector<8x64xf32>
    %cst_49 = arith.constant 0.000000e+00 : f32
    %157 = vector.broadcast %cst_49 : f32 to vector<8x64xf32>
    %158 = arith.maximumf %156, %157 : vector<8x64xf32>
    %c176 = arith.constant 176 : index
    %c0_50 = arith.constant 0 : index
    %159 = vector.load %arg1[%c176, %c0_50] : memref<400x128xbf16, #tpu.memory_space<vmem>>, vector<64x32xbf16>
    %160 = arith.truncf %158 : vector<8x64xf32> to vector<8x64xbf16>
    %cst_51 = arith.constant dense<0.000000e+00> : vector<8x32xf32>
    %161 = tpu.matmul %160, %159, %cst_51 {dimension_numbers = #tpu.dot_dimension_numbers<[1], [0], [0], [1], [0, 0, 1, 1], [], []>} : vector<8x64xbf16>, vector<64x32xbf16>, vector<8x32xf32> -> vector<8x32xf32>
    %162 = vector.broadcast %72 : vector<1x32xf32> to vector<8x32xf32>
    %163 = arith.addf %161, %162 : vector<8x32xf32>
    %164 = arith.mulf %163, %163 : vector<8x32xf32>
    %cst_52 = arith.constant dense<0.000000e+00> : vector<8xf32>
    %165 = vector.multi_reduction <add>, %164, %cst_52 [1] : vector<8x32xf32> to vector<8xf32>
    %166 = vector.shape_cast %165 : vector<8xf32> to vector<8x1xf32>
    %cst_53 = arith.constant 1.000000e-24 : f32
    %167 = vector.broadcast %cst_53 : f32 to vector<8x1xf32>
    %168 = arith.maximumf %166, %167 : vector<8x1xf32>
    %169 = math.rsqrt %168 : vector<8x1xf32>
    %170 = vector.broadcast %169 : vector<8x1xf32> to vector<8x32xf32>
    %171 = arith.mulf %163, %170 : vector<8x32xf32>
    %172 = arith.subf %171, %151 : vector<8x32xf32>
    %173 = vector.broadcast %74 : f32 to vector<8x32xf32>
    %174 = arith.mulf %173, %172 : vector<8x32xf32>
    %175 = arith.addf %151, %174 : vector<8x32xf32>
    %176 = arith.mulf %175, %175 : vector<8x32xf32>
    %cst_54 = arith.constant dense<0.000000e+00> : vector<8xf32>
    %177 = vector.multi_reduction <add>, %176, %cst_54 [1] : vector<8x32xf32> to vector<8xf32>
    %178 = vector.shape_cast %177 : vector<8xf32> to vector<8x1xf32>
    %cst_55 = arith.constant 1.000000e-24 : f32
    %179 = vector.broadcast %cst_55 : f32 to vector<8x1xf32>
    %180 = arith.maximumf %178, %179 : vector<8x1xf32>
    %181 = math.rsqrt %180 : vector<8x1xf32>
    %182 = vector.broadcast %181 : vector<8x1xf32> to vector<8x32xf32>
    %183 = arith.mulf %175, %182 : vector<8x32xf32>
    %c64 = arith.constant 64 : index
    %c0_56 = arith.constant 0 : index
    %184 = vector.load %arg2[%c64, %c0_56] : memref<72x128xf32, #tpu.memory_space<vmem>>, vector<1x96xf32>
    %c65 = arith.constant 65 : index
    %c0_57 = arith.constant 0 : index
    %185 = vector.load %arg2[%c65, %c0_57] : memref<72x128xf32, #tpu.memory_space<vmem>>, vector<1x32xf32>
    %c66 = arith.constant 66 : index
    %c0_58 = arith.constant 0 : index
    %186 = vector.load %arg2[%c66, %c0_58] : memref<72x128xf32, #tpu.memory_space<vmem>>, vector<1x64xf32>
    %c67 = arith.constant 67 : index
    %c0_59 = arith.constant 0 : index
    %187 = vector.load %arg2[%c67, %c0_59] : memref<72x128xf32, #tpu.memory_space<vmem>>, vector<1x32xf32>
    %c0_60 = arith.constant 0 : index
    %c1_61 = arith.constant 1 : index
    %188 = memref.load %arg3[%c0_60, %c1_61] : memref<2x2xf32, #tpu.memory_space<smem>>
    %c1_62 = arith.constant 1 : index
    %c1_63 = arith.constant 1 : index
    %189 = memref.load %arg3[%c1_62, %c1_63] : memref<2x2xf32, #tpu.memory_space<smem>>
    %190 = arith.mulf %183, %183 : vector<8x32xf32>
    %cst_64 = arith.constant dense<0.000000e+00> : vector<8xf32>
    %191 = vector.multi_reduction <add>, %190, %cst_64 [1] : vector<8x32xf32> to vector<8xf32>
    %192 = vector.shape_cast %191 : vector<8xf32> to vector<8x1xf32>
    %cst_65 = arith.constant 1.000000e-24 : f32
    %193 = vector.broadcast %cst_65 : f32 to vector<8x1xf32>
    %194 = arith.maximumf %192, %193 : vector<8x1xf32>
    %195 = math.rsqrt %194 : vector<8x1xf32>
    %196 = vector.broadcast %195 : vector<8x1xf32> to vector<8x32xf32>
    %197 = arith.mulf %183, %196 : vector<8x32xf32>
    %c240 = arith.constant 240 : index
    %c0_66 = arith.constant 0 : index
    %198 = vector.load %arg1[%c240, %c0_66] : memref<400x128xbf16, #tpu.memory_space<vmem>>, vector<32x96xbf16>
    %199 = arith.truncf %197 : vector<8x32xf32> to vector<8x32xbf16>
    %cst_67 = arith.constant dense<0.000000e+00> : vector<8x96xf32>
    %200 = tpu.matmul %199, %198, %cst_67 {dimension_numbers = #tpu.dot_dimension_numbers<[1], [0], [0], [1], [0, 0, 1, 1], [], []>} : vector<8x32xbf16>, vector<32x96xbf16>, vector<8x96xf32> -> vector<8x96xf32>
    %201 = vector.broadcast %184 : vector<1x96xf32> to vector<8x96xf32>
    %202 = arith.addf %200, %201 : vector<8x96xf32>
    %203 = vector.extract_strided_slice %202 {offsets = [0, 0], sizes = [8, 8], strides = [1, 1]} : vector<8x96xf32> to vector<8x8xf32>
    %204 = vector.extract_strided_slice %202 {offsets = [0, 8], sizes = [8, 8], strides = [1, 1]} : vector<8x96xf32> to vector<8x8xf32>
    %205 = vector.extract_strided_slice %202 {offsets = [0, 16], sizes = [8, 8], strides = [1, 1]} : vector<8x96xf32> to vector<8x8xf32>
    %206 = vector.extract_strided_slice %202 {offsets = [0, 24], sizes = [8, 8], strides = [1, 1]} : vector<8x96xf32> to vector<8x8xf32>
    %207 = tpu.concatenate %203, %204, %205, %206 in 0 : vector<8x8xf32>, vector<8x8xf32>, vector<8x8xf32>, vector<8x8xf32> -> vector<32x8xf32>
    %208 = vector.extract_strided_slice %202 {offsets = [0, 32], sizes = [8, 8], strides = [1, 1]} : vector<8x96xf32> to vector<8x8xf32>
    %209 = vector.extract_strided_slice %202 {offsets = [0, 40], sizes = [8, 8], strides = [1, 1]} : vector<8x96xf32> to vector<8x8xf32>
    %210 = vector.extract_strided_slice %202 {offsets = [0, 48], sizes = [8, 8], strides = [1, 1]} : vector<8x96xf32> to vector<8x8xf32>
    %211 = vector.extract_strided_slice %202 {offsets = [0, 56], sizes = [8, 8], strides = [1, 1]} : vector<8x96xf32> to vector<8x8xf32>
    %212 = tpu.concatenate %208, %209, %210, %211 in 0 : vector<8x8xf32>, vector<8x8xf32>, vector<8x8xf32>, vector<8x8xf32> -> vector<32x8xf32>
    %213 = vector.extract_strided_slice %202 {offsets = [0, 64], sizes = [8, 8], strides = [1, 1]} : vector<8x96xf32> to vector<8x8xf32>
    %214 = vector.extract_strided_slice %202 {offsets = [0, 72], sizes = [8, 8], strides = [1, 1]} : vector<8x96xf32> to vector<8x8xf32>
    %215 = vector.extract_strided_slice %202 {offsets = [0, 80], sizes = [8, 8], strides = [1, 1]} : vector<8x96xf32> to vector<8x8xf32>
    %216 = vector.extract_strided_slice %202 {offsets = [0, 88], sizes = [8, 8], strides = [1, 1]} : vector<8x96xf32> to vector<8x8xf32>
    %217 = tpu.concatenate %213, %214, %215, %216 in 0 : vector<8x8xf32>, vector<8x8xf32>, vector<8x8xf32>, vector<8x8xf32> -> vector<32x8xf32>
    %218 = arith.truncf %207 : vector<32x8xf32> to vector<32x8xbf16>
    %219 = arith.truncf %212 : vector<32x8xf32> to vector<32x8xbf16>
    %cst_68 = arith.constant dense<0.000000e+00> : vector<32x32xf32>
    %220 = tpu.matmul %218, %219, %cst_68 {dimension_numbers = #tpu.dot_dimension_numbers<[1], [1], [0], [0], [0, 0, 1, 0], [], []>} : vector<32x8xbf16>, vector<32x8xbf16>, vector<32x32xf32> -> vector<32x32xf32>
    %cst_69 = arith.constant 0.353553385 : f32
    %221 = vector.broadcast %cst_69 : f32 to vector<32x32xf32>
    %222 = arith.mulf %220, %221 : vector<32x32xf32>
    %223 = arith.addf %222, %6 : vector<32x32xf32>
    %cst_70 = arith.constant dense<0xFF800000> : vector<32xf32>
    %224 = vector.multi_reduction <maximumf>, %223, %cst_70 [1] : vector<32x32xf32> to vector<32xf32>
    %225 = vector.shape_cast %224 : vector<32xf32> to vector<32x1xf32>
    %226 = vector.broadcast %225 : vector<32x1xf32> to vector<32x32xf32>
    %227 = arith.subf %223, %226 : vector<32x32xf32>
    %228 = math.exp %227 : vector<32x32xf32>
    %cst_71 = arith.constant dense<0.000000e+00> : vector<32xf32>
    %229 = vector.multi_reduction <add>, %228, %cst_71 [1] : vector<32x32xf32> to vector<32xf32>
    %230 = vector.shape_cast %229 : vector<32xf32> to vector<32x1xf32>
    %231 = tpu.reciprocal %230 {approx = true} : vector<32x1xf32> -> vector<32x1xf32>
    %232 = vector.broadcast %231 : vector<32x1xf32> to vector<32x32xf32>
    %233 = arith.mulf %228, %232 : vector<32x32xf32>
    %234 = arith.truncf %233 : vector<32x32xf32> to vector<32x32xbf16>
    %235 = arith.truncf %217 : vector<32x8xf32> to vector<32x8xbf16>
    %cst_72 = arith.constant dense<0.000000e+00> : vector<32x8xf32>
    %236 = tpu.matmul %234, %235, %cst_72 {dimension_numbers = #tpu.dot_dimension_numbers<[1], [0], [0], [1], [0, 0, 1, 1], [], []>} : vector<32x32xbf16>, vector<32x8xbf16>, vector<32x8xf32> -> vector<32x8xf32>
    %237 = vector.extract_strided_slice %236 {offsets = [0, 0], sizes = [8, 8], strides = [1, 1]} : vector<32x8xf32> to vector<8x8xf32>
    %238 = vector.extract_strided_slice %236 {offsets = [8, 0], sizes = [8, 8], strides = [1, 1]} : vector<32x8xf32> to vector<8x8xf32>
    %239 = vector.extract_strided_slice %236 {offsets = [16, 0], sizes = [8, 8], strides = [1, 1]} : vector<32x8xf32> to vector<8x8xf32>
    %240 = vector.extract_strided_slice %236 {offsets = [24, 0], sizes = [8, 8], strides = [1, 1]} : vector<32x8xf32> to vector<8x8xf32>
    %241 = tpu.concatenate %237, %238, %239, %240 in 1 : vector<8x8xf32>, vector<8x8xf32>, vector<8x8xf32>, vector<8x8xf32> -> vector<8x32xf32>
    %c272 = arith.constant 272 : index
    %c0_73 = arith.constant 0 : index
    %242 = vector.load %arg1[%c272, %c0_73] : memref<400x128xbf16, #tpu.memory_space<vmem>>, vector<32x32xbf16>
    %243 = arith.truncf %241 : vector<8x32xf32> to vector<8x32xbf16>
    %cst_74 = arith.constant dense<0.000000e+00> : vector<8x32xf32>
    %244 = tpu.matmul %243, %242, %cst_74 {dimension_numbers = #tpu.dot_dimension_numbers<[1], [0], [0], [1], [0, 0, 1, 1], [], []>} : vector<8x32xbf16>, vector<32x32xbf16>, vector<8x32xf32> -> vector<8x32xf32>
    %245 = vector.broadcast %185 : vector<1x32xf32> to vector<8x32xf32>
    %246 = arith.addf %244, %245 : vector<8x32xf32>
    %247 = arith.mulf %246, %246 : vector<8x32xf32>
    %cst_75 = arith.constant dense<0.000000e+00> : vector<8xf32>
    %248 = vector.multi_reduction <add>, %247, %cst_75 [1] : vector<8x32xf32> to vector<8xf32>
    %249 = vector.shape_cast %248 : vector<8xf32> to vector<8x1xf32>
    %cst_76 = arith.constant 1.000000e-24 : f32
    %250 = vector.broadcast %cst_76 : f32 to vector<8x1xf32>
    %251 = arith.maximumf %249, %250 : vector<8x1xf32>
    %252 = math.rsqrt %251 : vector<8x1xf32>
    %253 = vector.broadcast %252 : vector<8x1xf32> to vector<8x32xf32>
    %254 = arith.mulf %246, %253 : vector<8x32xf32>
    %255 = arith.subf %254, %197 : vector<8x32xf32>
    %256 = vector.broadcast %188 : f32 to vector<8x32xf32>
    %257 = arith.mulf %256, %255 : vector<8x32xf32>
    %258 = arith.addf %197, %257 : vector<8x32xf32>
    %259 = arith.mulf %258, %258 : vector<8x32xf32>
    %cst_77 = arith.constant dense<0.000000e+00> : vector<8xf32>
    %260 = vector.multi_reduction <add>, %259, %cst_77 [1] : vector<8x32xf32> to vector<8xf32>
    %261 = vector.shape_cast %260 : vector<8xf32> to vector<8x1xf32>
    %cst_78 = arith.constant 1.000000e-24 : f32
    %262 = vector.broadcast %cst_78 : f32 to vector<8x1xf32>
    %263 = arith.maximumf %261, %262 : vector<8x1xf32>
    %264 = math.rsqrt %263 : vector<8x1xf32>
    %265 = vector.broadcast %264 : vector<8x1xf32> to vector<8x32xf32>
    %266 = arith.mulf %258, %265 : vector<8x32xf32>
    %c304 = arith.constant 304 : index
    %c0_79 = arith.constant 0 : index
    %267 = vector.load %arg1[%c304, %c0_79] : memref<400x128xbf16, #tpu.memory_space<vmem>>, vector<32x64xbf16>
    %268 = arith.truncf %266 : vector<8x32xf32> to vector<8x32xbf16>
    %cst_80 = arith.constant dense<0.000000e+00> : vector<8x64xf32>
    %269 = tpu.matmul %268, %267, %cst_80 {dimension_numbers = #tpu.dot_dimension_numbers<[1], [0], [0], [1], [0, 0, 1, 1], [], []>} : vector<8x32xbf16>, vector<32x64xbf16>, vector<8x64xf32> -> vector<8x64xf32>
    %270 = vector.broadcast %186 : vector<1x64xf32> to vector<8x64xf32>
    %271 = arith.addf %269, %270 : vector<8x64xf32>
    %cst_81 = arith.constant 0.000000e+00 : f32
    %272 = vector.broadcast %cst_81 : f32 to vector<8x64xf32>
    %273 = arith.maximumf %271, %272 : vector<8x64xf32>
    %c336 = arith.constant 336 : index
    %c0_82 = arith.constant 0 : index
    %274 = vector.load %arg1[%c336, %c0_82] : memref<400x128xbf16, #tpu.memory_space<vmem>>, vector<64x32xbf16>
    %275 = arith.truncf %273 : vector<8x64xf32> to vector<8x64xbf16>
    %cst_83 = arith.constant dense<0.000000e+00> : vector<8x32xf32>
    %276 = tpu.matmul %275, %274, %cst_83 {dimension_numbers = #tpu.dot_dimension_numbers<[1], [0], [0], [1], [0, 0, 1, 1], [], []>} : vector<8x64xbf16>, vector<64x32xbf16>, vector<8x32xf32> -> vector<8x32xf32>
    %277 = vector.broadcast %187 : vector<1x32xf32> to vector<8x32xf32>
    %278 = arith.addf %276, %277 : vector<8x32xf32>
    %279 = arith.mulf %278, %278 : vector<8x32xf32>
    %cst_84 = arith.constant dense<0.000000e+00> : vector<8xf32>
    %280 = vector.multi_reduction <add>, %279, %cst_84 [1] : vector<8x32xf32> to vector<8xf32>
    %281 = vector.shape_cast %280 : vector<8xf32> to vector<8x1xf32>
    %cst_85 = arith.constant 1.000000e-24 : f32
    %282 = vector.broadcast %cst_85 : f32 to vector<8x1xf32>
    %283 = arith.maximumf %281, %282 : vector<8x1xf32>
    %284 = math.rsqrt %283 : vector<8x1xf32>
    %285 = vector.broadcast %284 : vector<8x1xf32> to vector<8x32xf32>
    %286 = arith.mulf %278, %285 : vector<8x32xf32>
    %287 = arith.subf %286, %266 : vector<8x32xf32>
    %288 = vector.broadcast %189 : f32 to vector<8x32xf32>
    %289 = arith.mulf %288, %287 : vector<8x32xf32>
    %290 = arith.addf %266, %289 : vector<8x32xf32>
    %291 = arith.mulf %290, %290 : vector<8x32xf32>
    %cst_86 = arith.constant dense<0.000000e+00> : vector<8xf32>
    %292 = vector.multi_reduction <add>, %291, %cst_86 [1] : vector<8x32xf32> to vector<8xf32>
    %293 = vector.shape_cast %292 : vector<8xf32> to vector<8x1xf32>
    %cst_87 = arith.constant 1.000000e-24 : f32
    %294 = vector.broadcast %cst_87 : f32 to vector<8x1xf32>
    %295 = arith.maximumf %293, %294 : vector<8x1xf32>
    %296 = math.rsqrt %295 : vector<8x1xf32>
    %297 = vector.broadcast %296 : vector<8x1xf32> to vector<8x32xf32>
    %298 = arith.mulf %290, %297 : vector<8x32xf32>
    %299 = arith.truncf %7 : vector<2x8xf32> to vector<2x8xbf16>
    %300 = arith.truncf %298 : vector<8x32xf32> to vector<8x32xbf16>
    %cst_88 = arith.constant dense<0.000000e+00> : vector<2x32xf32>
    %301 = tpu.matmul %299, %300, %cst_88 {dimension_numbers = #tpu.dot_dimension_numbers<[1], [0], [0], [1], [0, 0, 1, 1], [], []>} : vector<2x8xbf16>, vector<8x32xbf16>, vector<2x32xf32> -> vector<2x32xf32>
    %c48_89 = arith.constant 48 : index
    %c0_90 = arith.constant 0 : index
    %302 = vector.load %arg1[%c48_89, %c0_90] : memref<400x128xbf16, #tpu.memory_space<vmem>>, vector<32x128xbf16>
    %303 = arith.truncf %301 : vector<2x32xf32> to vector<2x32xbf16>
    %cst_91 = arith.constant dense<0.000000e+00> : vector<2x128xf32>
    %304 = tpu.matmul %303, %302, %cst_91 {dimension_numbers = #tpu.dot_dimension_numbers<[1], [0], [0], [1], [0, 0, 1, 1], [], []>} : vector<2x32xbf16>, vector<32x128xbf16>, vector<2x128xf32> -> vector<2x128xf32>
    %305 = vector.broadcast %4 : vector<1x128xf32> to vector<2x128xf32>
    %306 = arith.addf %304, %305 : vector<2x128xf32>
    %c0_92 = arith.constant 0 : index
    %c0_93 = arith.constant 0 : index
    %307 = vector.load %arg4[%c0_92, %c0_93] : memref<2x128xf32, #tpu.memory_space<vmem>>, vector<2x128xf32>
    tpu.vector_store %arg4[%c0_92, %c0_93], %306 {strides = array<i32>} : memref<2x128xf32, #tpu.memory_space<vmem>>, vector<2x128xf32>,
    return
  }
}

</mosaic_0001>

<bundles_post_ra>
// kernel: tpu_custom_call.1
= control target key start
LH: loop header
LB: loop body
LE: loop exit
PB: predicated region body
PF: predicated region fallthrough
CT: control target
= control target key end

     0   :  { %9 = vsyncpa [#allocation3], 0  ;;  %s2220_s0 = inlined_call_operand.hbm [shape: f32[2,16], index: 0, kind: input, shape index: {}]   ;;  %s2221_s1 = inlined_call_operand.hbm [shape: bf16[400,128], index: 1, kind: input, shape index: {}]   ;;  %s2222_s2 = inlined_call_operand.hbm [shape: f32[72,128], index: 2, kind: input, shape index: {}]   ;;  %s2223_s3 = inlined_call_operand.vmem [shape: f32[2,2], index: 3, kind: input, shape index: {}]   ;;  %s2224_s4 = inlined_call_operand.hbm [shape: f32[2,128], index: 4, kind: output, shape index: {}]  }
   0x1   :  { %10 = vsyncpa [#allocation7], 0 }
   0x2   :  { %11 = vsyncpa [#allocation5], 0 }
   0x3   :  { %12 = vsyncpa [#allocation4], 0  ;;  %s1940_s15 = smov [#allocation6]   ;;  %s1832_s19 = scalar_lea.hbm %s2221_s1, 3200 }
   0x4   :  { %s28_s16 = sshll.u32 %s1940_s15, 4  ;;  %p1833_p0 = scmp.ne.s32.totalorder %s2221_s1, %s1832_s19  ;;  %s29_s16 = int_to_ptr.vmem [resolvable:$true] %s28_s16 }
   0x5   :  { %p1836_p1 = scmp.lt.u32.totalorder %s1832_s19, %s2221_s1 }
   0x7   :  { %p1838_p2 = pnand %p1836_p1, %p1833_p0 }
   0x9   :  { %1841 = shalt.err (!%p1838_p2)
}
   0xa   :  { %s1842_s24 = scalar_lea.vmem %s29_s16, 3200  ;;  %p1847_p4 = scmp.lt.s32.totalorder %s29_s16, %s29_s16 }
   0xb   :  { %p1843_p3 = scmp.ne.s32.totalorder %s29_s16, %s1842_s24  ;;  %p1848_p5 = scmp.lt.s32.totalorder %s1842_s24, %s1842_s24 }
   0xd   :  { %p1849_p6 = por %p1848_p5, %p1847_p4 }
   0xf   :  { %p1850_p7 = pnand %p1849_p6, %p1843_p3 }
  0x11   :  { %1853 = shalt.err (!%p1850_p7)
}
  0x12   :  { %s1941_s25 = smov 64   ;;  %s1942_s26 = smov 4  }
  0x13   :  { %34 = dma.hbm_to_vmem [thread:$0]  %s2221_s1, 3200, %s29_s16, [#allocation7], %s1941_s25, %s1941_s25, %s1942_s26  }
  0x14   :  { %s1943_s29 = smov [#allocation2]   ;;  %s1944_s5 = smov [#allocation8]  }
  0x15   :  { %s19_s30 = sshll.u32 %s1943_s29, 4  ;;  %s40_s6 = sshll.u32 %s1944_s5, 4  ;;  %s20_s30 = int_to_ptr.vmem [resolvable:$true] %s19_s30  ;;  %s41_s6 = int_to_ptr.vmem [resolvable:$true] %s40_s6 }
  0x16   :  { %s1854_s9 = scalar_lea.hbm %s2220_s0, 32 }
  0x17   :  { %p1855_p8 = scmp.ne.s32.totalorder %s2220_s0, %s1854_s9  ;;  %p1858_p9 = scmp.lt.u32.totalorder %s1854_s9, %s2220_s0 }
  0x19   :  { %p1860_p10 = pnand %p1858_p9, %p1855_p8 }
  0x1b   :  { %1863 = shalt.err (!%p1860_p10)
}
  0x1c   :  { %s1864_s1 = scalar_lea.vmem %s20_s30, 32  ;;  %p1869_p12 = scmp.lt.s32.totalorder %s20_s30, %s20_s30 }
  0x1d   :  { %p1865_p11 = scmp.ne.s32.totalorder %s20_s30, %s1864_s1  ;;  %p1870_p13 = scmp.lt.s32.totalorder %s1864_s1, %s1864_s1 }
  0x1f   :  { %p1871_p0 = por %p1870_p13, %p1869_p12 }
  0x21   :  { %p1872_p1 = pnand %p1871_p0, %p1865_p11 }
  0x23   :  { %1875 = shalt.err (!%p1872_p1)
}
  0x24   :  { %22 = dma.hbm_to_vmem [thread:$0]  %s2220_s0, 32, %s20_s30, [#allocation3]  }
  0x25   :  { %s53_s18 = sshll.u32 %s2223_s3, 4  ;;  %s1876_s21 = scalar_lea.hbm %s2222_s2, 1152  ;;  %s54_s18 = int_to_ptr.vmem [resolvable:$true] %s53_s18 }
  0x26   :  { %p1877_p2 = scmp.ne.s32.totalorder %s2222_s2, %s1876_s21  ;;  %p1880_p3 = scmp.lt.u32.totalorder %s1876_s21, %s2222_s2 }
  0x28   :  { %p1882_p4 = pnand %p1880_p3, %p1877_p2 }
  0x2a   :  { %1885 = shalt.err (!%p1882_p4)
}
  0x2b   :  { %s1886_s0 = scalar_lea.vmem %s41_s6, 1152  ;;  %p1891_p6 = scmp.lt.s32.totalorder %s41_s6, %s41_s6 }
  0x2c   :  { %p1887_p5 = scmp.ne.s32.totalorder %s41_s6, %s1886_s0  ;;  %p1892_p7 = scmp.lt.s32.totalorder %s1886_s0, %s1886_s0 }
  0x2e   :  { %p1893_p8 = por %p1892_p7, %p1891_p6 }
  0x30   :  { %p1894_p9 = pnand %p1893_p8, %p1887_p5 }
  0x32   :  { %1897 = shalt.err (!%p1894_p9)
}
  0x33   :  { %s1945_s3 = smov 128   ;;  %s1946_s27 = smov 8  }
  0x34   :  { %46 = dma.hbm_to_vmem [thread:$0]  %s2222_s2, 1152, %s41_s6, [#allocation7], %s1945_s3, %s1945_s3, %s1946_s27  }
  0x35   :  { %s1898_s30 = scalar_lea.vmem %s54_s18, 32  ;;  %p1903_p11 = scmp.lt.s32.totalorder %s54_s18, %s54_s18 }
  0x36   :  { %p1899_p10 = scmp.ne.s32.totalorder %s54_s18, %s1898_s30  ;;  %p1904_p12 = scmp.lt.s32.totalorder %s1898_s30, %s1898_s30 }
  0x38   :  { %p1905_p13 = por %p1904_p12, %p1903_p11 }
  0x3a   :  { %p1906_p0 = pnand %p1905_p13, %p1899_p10 }
  0x3c   :  { %1909 = shalt.err (!%p1906_p0)
}
  0x3d   :  { %s1947_s5 = smov [#allocation9]  }
  0x3e   :  { %56 = dma.vmem_to_smem %s54_s18, 32, %s1947_s5, [#allocation5]  }
  0x3f   :  { %1932 = dma.done.wait [#allocation3], 32  }
  0x40   :  { %1933 = vsyncadd [#allocation3], 4294967264 }
  0x41   :  { %1934 = dma.done.wait [#allocation7], 4352  }
  0x42   :  { %1935 = vsyncadd [#allocation7], 4294962944 }
  0x43   :  { %1936 = dma.done.wait [#allocation5], 32  }
  0x44   :  { %1937 = vsyncadd [#allocation5], 4294967264 }
  0x45   :  { %69 = sfence }
  0x46   :  { %v1749_v0 = vld [vmem:[#allocation6] sm:$0xff]   ;;  %v1948_v1 = vmov 0.0   ;;  %v82_v2 = vld [vmem:[#allocation2] sm:$0x3]  ;;  %vm96_vm0 = vcmask 130048   ;;  %vm1949_vm1 = vmmov 0  }
  0x47   :  { %1595 = vmatprep.subr.bf16.mxu0 %v1948_v1  ;;  %1601 = vmatprep.subr.bf16.mxu1 %v1948_v1  ;;  %v85_v3 = vpack.c.bf16 %v82_v2, %v82_v2  ;;  %v1480_v4 = vld [vmem:[#allocation8] ss:$0 sm:$0xff]  ;;  %vm141_vm2 = vcmask 254976   ;;  %v1751_v13 = vld [vmem:[#allocation6 + $0x10] sm:$0xff]   ;;  %vm169_vm3 = vcmask 261120   ;;  %vm213_vm4 = vcmask 1041408  }
  0x48   :  { %1596 = vmatpush3.bf16.msra.mxu0 %v1749_v0  ;;  %1597 = vmatprep.mubr.msk.bf16.mxu0 %vm1949_vm1, %v1948_v1  ;;  %v1750_v12 = vld [vmem:[#allocation6 + $0x8] sm:$0xff]   ;;  %s1950_s2 = smov 96   ;;  %s1951_s6 = smov 32   ;;  %vm264_vm5 = vcmask 1040384   ;;  %vm267_vm6 = vcmask 1042432   ;;  %vm269_vm7 = vcmask 1043456  }
  0x49   :  { %1605 = vmatprep.mubr.msk.bf16.mxu1 %vm1949_vm1, %v1948_v1  ;;  %1609 = vmatprep.subr.bf16.mxu0 %v1948_v1  ;;  %v1483_v19 = vld [vmem:[#allocation8 + $0x1] ss:$0 sm:$0xff]  ;;  %v1487_v35 = vld [vmem:[#allocation8 + $0x2] ss:$0 sm:$0xff]  ;;  %v1488_v37 = vld [vmem:[#allocation8 + $0x3] ss:$0 sm:$0xff] }
  0x4a   :  { %1602 = vmatpush3.bf16.msra.mxu1 %v1750_v12  ;;  %vm271_vm8 = vcmask 1044480   ;;  %vm273_vm9 = vcmask 1045504   ;;  %vm275_vm10 = vcmask 1046528   ;;  %v76_v0 = vld [vmem:[#allocation8 + $0x8] sm:$0xff]  ;;  %s1952_s7 = smov 112   ;;  %s1953_s8 = smov 120  }
  0x4b   :  { %1598 = vmatmul.mubr.msk.bf16.vlgmr.msra.gmra.mrb[0].mxu0 %vm96_vm0, %v85_v3  ;;  %1603 = vmatprep.subr.bf16.mxu1 %v1948_v1  ;;  %s1954_s9 = smov 104   ;;  %vm380_vm11 = vcmask 64512   ;;  %s1955_s10 = smov 24   ;;  %vm571_vm12 = vcmask 195584   ;;  %vm757_vm13 = vcmask 523264  }
  0x4c   :  { %1613 = vmatprep.mubr.msk.bf16.mxu0 %vm1949_vm1, %v1948_v1  ;;  %s1956_s11 = smov 16   ;;  %s289_s12 = sld [smem:[#allocation9]] }
  0x4d   :  { %s1489_s13 = sld [smem:[#allocation9 + $0x80]]  ;;  %s1513_s1 = sld [smem:[#allocation9 + $0x81]] }
  0x4e   :  { %1604 = vmatpush3.bf16.msra.mxu1 %v1751_v13  ;;  %v1490_v13 = vld [vmem:[#allocation8 + $0x38] ss:$0 sm:$0xff]  ;;  %s1957_s14 = smov [#allocation10]  }
  0x4f   :  { %s1469_s15 = sshll.u32 %s1957_s14, 4  ;;  %s1470_s15 = int_to_ptr.vmem [resolvable:$true] %s1469_s15 }
  0x50   :  { %s1910_s16 = scalar_lea.vmem %s1470_s15, 32  ;;  %p1915_p2 = scmp.lt.s32.totalorder %s1470_s15, %s1470_s15 }
  0x51   :  { %p1911_p1 = scmp.ne.s32.totalorder %s1470_s15, %s1910_s16  ;;  %p1916_p3 = scmp.lt.s32.totalorder %s1910_s16, %s1910_s16 }
  0x53   :  { %p1917_p4 = por %p1916_p3, %p1915_p2 }
  0x55   :  { %p1918_p5 = pnand %p1917_p4, %p1911_p1 }
 0x11e   :  { %v134_v5 = vpop.f32.mrb[0].mxu0 }
 0x11f   :  { %v135_v6 = vadd.f32 %v1480_v4, %v134_v5  ;;  %v1599_v7 = vpop.f32.mrb[1].mxu0 }
 0x120   :  { %v137_v8 = vpop.f32.mrb[2].mxu0  ;;  %v1753_v7 = vld [vmem:[#allocation6 + $0x30] sm:$0xff]  }
 0x121   :  { %v1600_v9 = vpop.f32.mrb[3].mxu0  ;;  %v140_v10 = vmul.f32 %v135_v6, %v135_v6 }
 0x123   :  { %v142_v11 = vsel %vm141_vm2, %v140_v10, 0.0 }
 0x124   :  { %143 = vadd.xlane.f32.xlu0 %v142_v11 }
 0x1b1   :  { %v144_v14 = vpop.xlane.xlu0 %143 }
 0x1b2   :  { %v145_v15 = vmax.f32 %v144_v14, 1e-24 }
 0x1b4   :  { %1774 = vrsqrt.f32 %v145_v15 }
 0x1be   :  { %v1775_v16 = vpop.eup %1774 }
 0x1bf   :  { %v147_v17 = vmul.f32 %v1775_v16, %v135_v6  ;;  %v1752_v6 = vld [vmem:[#allocation6 + $0x28] sm:$0xff]  }
 0x1c0   :  { %1610 = vmatpush3.bf16.msra.mxu0 %v1752_v6 }
 0x1c1   :  { %v152_v18 = vpack.c.bf16 %v147_v17, %v147_v17  ;;  %1611 = vmatprep.subr.bf16.mxu0 %v1948_v1 }
 0x1c3   :  { %1606 = vmatmul.mubr.msk.bf16.vlgmr.msra.gmra.mrb[0].mxu1 %vm169_vm3, %v152_v18 }
 0x1c4   :  { %1612 = vmatpush3.bf16.msra.mxu0 %v1753_v7 }
 0x296   :  { %v207_v20 = vpop.f32.mrb[0].mxu1 }
 0x297   :  { %v208_v21 = vadd.f32 %v1483_v19, %v207_v20  ;;  %v1607_v22 = vpop.f32.mrb[1].mxu1 }
 0x298   :  { %v210_v23 = vpop.f32.mrb[2].mxu1 }
 0x299   :  { %v1608_v24 = vpop.f32.mrb[3].mxu1  ;;  %v214_v25 = vsel %vm213_vm4, %v208_v21, 0.0 }
 0x29a   :  { %215 = vadd.xlane.f32.xlu0 %v214_v25 }
 0x327   :  { %v216_v26 = vpop.xlane.xlu0 %215 }
 0x328   :  { %v218_v27 = vmul.f32 0.0078125, %v216_v26 }
 0x32a   :  { %v219_v28 = vsub.f32 %v208_v21, %v218_v27 }
 0x32c   :  { %v220_v29 = vmul.f32 %v219_v28, %v219_v28 }
 0x32e   :  { %v221_v30 = vsel %vm213_vm4, %v220_v29, 0.0 }
 0x32f   :  { %222 = vadd.xlane.f32.xlu1 %v221_v30  ;;  %v2075_v30 = vld [vmem:[#allocation8 + $0x10] sm:$0xff] }
 0x3bc   :  { %v223_v31 = vpop.xlane.xlu1 %222 }
 0x3bd   :  { %v224_v32 = vmul.f32 0.0078125, %v223_v31 }
 0x3bf   :  { %v225_v33 = vadd.f32 1e-05, %v224_v32 }
 0x3c1   :  { %1776 = vrsqrt.f32 %v225_v33 }
 0x3cb   :  { %v1777_v34 = vpop.eup %1776 }
 0x3cc   :  { %v227_v36 = vmul.f32 %v1777_v34, %v219_v28 }
 0x3ce   :  { %v232_v38 = vmul.f32 %v1487_v35, %v227_v36  ;;  %v2077_v35 = vld [vmem:[#allocation8 + $0x18] sm:$0xff]  ;;  %v2079_v36 = vld [vmem:[#allocation8 + $0x20] sm:$0xff] }
 0x3d0   :  { %v237_v39 = vadd.f32 %v1488_v37, %v232_v38 }
 0x3d2   :  { %v243_v40 = vrot.slane %v237_v39, 6  ;;  %v239_v41 = vrot.slane %v237_v39, 7  ;;  %v260_v42 = vrot.slane %v237_v39, 2  ;;  %v247_v43 = vrot.slane %v237_v39, 5 }
 0x3d3   :  { %v252_v44 = vrot.slane %v237_v39, 4  ;;  %v256_v45 = vrot.slane %v237_v39, 3 }
 0x3d4   :  { %244 = vrot.lane.b32.xlu0 %v243_v40, %s1941_s25  ;;  %240 = vrot.lane.b32.xlu1 %v239_v41, %s1950_s2 }
 0x3d8   :  { %261 = vrot.lane.b32.xlu0 %v260_v42, %s1951_s6  ;;  %248 = vrot.lane.b32.xlu1 %v247_v43, %s1951_s6 }
 0x3dc   :  { %253 = vrot.lane.b32.xlu1 %v252_v44, %s1950_s2 }
 0x3e0   :  { %257 = vrot.lane.b32.xlu1 %v256_v45, %s1941_s25 }
 0x446   :  { %v241_v46 = vpop.permute.xlu1 %240  ;;  %v245_v47 = vpop.permute.xlu0 %244 }
 0x447   :  { %v265_v48 = vsel %vm264_vm5, %v237_v39, %v241_v46 }
 0x448   :  { %v266_v50 = vsel %vm213_vm4, %v265_v48, %v245_v47 }
 0x44a   :  { %v249_v49 = vpop.permute.xlu1 %248  ;;  %v262_v56 = vpop.permute.xlu0 %261 }
 0x44b   :  { %v268_v51 = vsel %vm267_vm6, %v266_v50, %v249_v49 }
 0x44c   :  { %v270_v53 = vsel %vm269_vm7, %v268_v51, %v247_v43  ;;  %v2085_v43 = vld [vmem:[#allocation8 + $0x28] sm:$0xff] }
 0x44e   :  { %v254_v52 = vpop.permute.xlu1 %253 }
 0x44f   :  { %v272_v54 = vsel %vm271_vm8, %v270_v53, %v254_v52 }
 0x452   :  { %v258_v55 = vpop.permute.xlu1 %257 }
 0x453   :  { %v274_v57 = vsel %vm273_vm9, %v272_v54, %v258_v55 }
 0x454   :  { %v276_v58 = vsel %vm275_vm10, %v274_v57, %v262_v56 }
 0x455   :  { %v277_v59 = vmul.f32 %v276_v58, %v276_v58 }
 0x457   :  { %v278_v60 = vsel %vm169_vm3, %v277_v59, 0.0 }
 0x458   :  { %279 = vadd.xlane.f32.xlu1 %v278_v60 }
 0x4e5   :  { %v280_v61 = vpop.xlane.xlu1 %279 }
 0x4e6   :  { %v281_v62 = vmax.f32 %v280_v61, 1e-24 }
 0x4e8   :  { %1778 = vrsqrt.f32 %v281_v62 }
 0x4f2   :  { %v1779_v63 = vpop.eup %1778 }
 0x4f3   :  { %v283_v2 = vmul.f32 %v1779_v63, %v276_v58 }
 0x4f5   :  { %v284_v3 = vadd.f32 %v283_v2, %v76_v0 }
 0x4f7   :  { %v291_v4 = vmul.f32 %v284_v3, %v284_v3 }
 0x4f9   :  { %v292_v5 = vsel %vm169_vm3, %v291_v4, 0.0 }
 0x4fa   :  { %293 = vadd.xlane.f32.xlu0 %v292_v5 }
 0x587   :  { %v294_v8 = vpop.xlane.xlu0 %293 }
 0x588   :  { %v295_v9 = vmax.f32 %v294_v8, 1e-24 }
 0x58a   :  { %1780 = vrsqrt.f32 %v295_v9 }
 0x594   :  { %v1781_v10 = vpop.eup %1780 }
 0x595   :  { %v2048_v11 = vmul.f32 %v1781_v10, %v284_v3 }
 0x597   :  { %v302_v12 = vpack.c.bf16 %v2048_v11, %v2048_v11 }
 0x599   :  { %1614 = vmatmul.mubr.msk.bf16.vlgmr.msra.gmra.mrb[4].mxu0 %vm169_vm3, %v302_v12 }
 0x66c   :  { %v356_v14 = vpop.f32.mrb[4].mxu0 }
 0x66d   :  { %v357_v15 = vadd.f32 %v1490_v13, %v356_v14  ;;  %v1615_v16 = vpop.f32.mrb[5].mxu0 }
 0x66e   :  { %v359_v17 = vpop.f32.mrb[6].mxu0 }
 0x66f   :  { %366 = vrot.lane.b32.xlu1 %v357_v15, %s1952_s7  ;;  %363 = vrot.lane.b32.xlu0 %v357_v15, %s1953_s8  ;;  %v1616_v18 = vpop.f32.mrb[7].mxu0 }
 0x673   :  { %369 = vrot.lane.b32.xlu1 %v357_v15, %s1954_s9 }
 0x6e1   :  { %v367_v19 = vpop.permute.xlu1 %366  ;;  %v364_v20 = vpop.permute.xlu0 %363 }
 0x6e2   :  { %v2056_v21 = vpack.c.bf16 %v364_v20, %v357_v15 }
 0x6e4   :  { %376 = vrot.lane.b32.xlu0 %v2056_v21, %s1950_s2  ;;  %1621 = vmatprep.mubr.msk.bf16.mxu1 %vm380_vm11, %v2056_v21 }
 0x6e5   :  { %v370_v22 = vpop.permute.xlu1 %369 }
 0x6e6   :  { %v2062_v23 = vpack.c.bf16 %v370_v22, %v367_v19  ;;  %v1754_v22 = vld [vmem:[#allocation6 + $0x38] sm:$0xff]  }
 0x6e8   :  { %378 = vrot.lane.b32.xlu1 %v2062_v23, %s1950_s2 }
 0x756   :  { %v377_v24 = vpop.permute.xlu0 %376 }
 0x757   :  { %v388_v25 = vsel %vm380_vm11, %v377_v24, 0  ;;  %1727 = vmatprep.subr.msk.bf16.mxu1 %vm380_vm11, %v377_v24 }
 0x758   :  { %1618 = vmatpush3.bf16.xpose.msra.mxu1 %v388_v25 }
 0x75a   :  { %v379_v26 = vpop.permute.xlu1 %378 }
 0x75b   :  { %1728 = vmatprep.subr.msk.bf16.mxu1 %vm380_vm11, %v379_v26  ;;  %v391_v27 = vsel %vm380_vm11, %v379_v26, 0 }
 0x760   :  { %1620 = vmatpush3.bf16.xpose.msra.mxu1 %v391_v27 }
 0x761   :  { %1641 = vmatprep.subr.bf16.mxu1 %v1948_v1 }
 0x767   :  { %1622 = vmatmul.mubr.msk.bf16.vlgmr.msra.gmra.mrb[4].mxu1 %vm380_vm11, %v2062_v23 }
 0x768   :  { %1645 = vmatprep.mubr.msk.bf16.mxu1 %vm1949_vm1, %v1948_v1 }
 0x83a   :  { %v1623_v28 = vpop.f32.mrb[4].mxu1 }
 0x83b   :  { %v427_v29 = vpop.f32.mrb[5].mxu1  ;;  %v444_v31 = vmul.f32 0.35355338, %v1623_v28 }
 0x83c   :  { %v442_v32 = vmul.f32 0.35355338, %v427_v29  ;;  %v1624_v33 = vpop.f32.mrb[6].mxu1 }
 0x83d   :  { %v430_v34 = vpop.f32.mrb[7].mxu1  ;;  %v445_v39 = vmul.f32 0.35355338, %v1624_v33  ;;  %v448_v42 = vadd.f32 %v444_v31, %v2079_v36 }
 0x83e   :  { %v443_v37 = vmul.f32 0.35355338, %v430_v34  ;;  %v446_v38 = vadd.f32 %v442_v32, %v2075_v30 }
 0x83f   :  { %v456_v45 = vsel %vm169_vm3, %v448_v42, -inf  ;;  %v449_v46 = vadd.f32 %v445_v39, %v2085_v43 }
 0x840   :  { %v450_v40 = vsel %vm169_vm3, %v446_v38, -inf  ;;  %v447_v41 = vadd.f32 %v443_v37, %v2077_v35 }
 0x841   :  { %451 = vmax.xlane.f32.xlu0 %v450_v40  ;;  %v459_v47 = vsel %vm169_vm3, %v449_v46, -inf }
 0x842   :  { %v453_v44 = vsel %vm169_vm3, %v447_v41, -inf }
 0x843   :  { %454 = vmax.xlane.f32.xlu1 %v453_v44 }
 0x845   :  { %457 = vmax.xlane.f32.xlu0 %v456_v45 }
 0x849   :  { %460 = vmax.xlane.f32.xlu0 %v459_v47 }
 0x8ce   :  { %v452_v48 = vpop.xlane.xlu0 %451 }
 0x8cf   :  { %v462_v49 = vsub.f32 %v446_v38, %v452_v48  ;;  %v1498_v38 = vld [vmem:[#allocation8 + $0x39] ss:$0 sm:$0xff] }
 0x8d0   :  { %v455_v50 = vpop.xlane.xlu1 %454 }
 0x8d1   :  { %v466_v53 = vmul.f32 1.442695, %v462_v49  ;;  %v463_v54 = vsub.f32 %v447_v41, %v455_v50 }
 0x8d2   :  { %v458_v51 = vpop.xlane.xlu0 %457 }
 0x8d3   :  { %v464_v52 = vsub.f32 %v448_v42, %v458_v51  ;;  %v468_v58 = vmul.f32 1.442695, %v463_v54  ;;  %v645_v51 = vstv %s289_s12 }
 0x8d5   :  { %v470_v55 = vmul.f32 1.442695, %v464_v52 }
 0x8d6   :  { %v461_v56 = vpop.xlane.xlu0 %460 }
 0x8d7   :  { %1782 = vpow2.f32 %v470_v55  ;;  %v465_v57 = vsub.f32 %v449_v46, %v461_v56 }
 0x8d8   :  { %1784 = vpow2.f32 %v466_v53 }
 0x8d9   :  { %v472_v59 = vmul.f32 1.442695, %v465_v57  ;;  %v1756_v57 = vld [vmem:[#allocation6 + $0x48] sm:$0xff]  }
 0x8da   :  { %1642 = vmatpush3.bf16.msra.mxu1 %v1756_v57 }
 0x8db   :  { %1786 = vpow2.f32 %v472_v59  ;;  %1643 = vmatprep.subr.bf16.mxu1 %v1948_v1  ;;  %v1758_v59 = vld [vmem:[#allocation6 + $0x58] sm:$0xff]  }
 0x8dc   :  { %1788 = vpow2.f32 %v468_v58  ;;  %v1757_v58 = vld [vmem:[#allocation6 + $0x50] sm:$0xff]  }
 0x8de   :  { %1644 = vmatpush3.bf16.msra.mxu1 %v1757_v58 }
 0x8df   :  { %1661 = vmatprep.subr.bf16.mxu1 %v1948_v1 }
 0x8e1   :  { %v1783_v60 = vpop.eup %1782 }
 0x8e2   :  { %v480_v61 = vsel %vm169_vm3, %v1783_v60, 0.0  ;;  %v1785_v62 = vpop.eup %1784 }
 0x8e3   :  { %481 = vadd.xlane.f32.xlu0 %v480_v61  ;;  %v474_v0 = vsel %vm169_vm3, %v1785_v62, 0.0 }
 0x8e5   :  { %v1787_v63 = vpop.eup %1786 }
 0x8e6   :  { %v483_v2 = vsel %vm169_vm3, %v1787_v63, 0.0  ;;  %v1789_v3 = vpop.eup %1788 }
 0x8e7   :  { %475 = vadd.xlane.f32.xlu0 %v474_v0  ;;  %484 = vadd.xlane.f32.xlu1 %v483_v2  ;;  %v477_v4 = vsel %vm169_vm3, %v1789_v3, 0.0  ;;  %v1760_v2 = vld [vmem:[#allocation6 + $0x68] sm:$0xff]  }
 0x8eb   :  { %478 = vadd.xlane.f32.xlu1 %v477_v4  ;;  %v1502_v4 = vld [vmem:[#allocation8 + $0x3a] ss:$0 sm:$0xff] }
 0x8fc   :  { %498 = vrot.lane.b32.xlu1 %v2062_v23, %s1941_s25  ;;  %v1755_v23 = vld [vmem:[#allocation6 + $0x40] sm:$0xff]  }
 0x8fd   :  { %496 = vrot.lane.b32.xlu0 %v2056_v21, %s1941_s25 }
 0x970   :  { %v482_v5 = vpop.xlane.xlu0 %481 }
 0x974   :  { %v476_v6 = vpop.xlane.xlu0 %475  ;;  %v485_v7 = vpop.xlane.xlu1 %484 }
 0x975   :  { %1790 = vrcp.f32 %v485_v7 }
 0x976   :  { %1792 = vrcp.f32 %v476_v6 }
 0x977   :  { %1794 = vrcp.f32 %v482_v5 }
 0x978   :  { %v497_v8 = vpop.permute.xlu0 %496  ;;  %v479_v9 = vpop.xlane.xlu1 %478 }
 0x979   :  { %1796 = vrcp.f32 %v479_v9  ;;  %1625 = vmatprep.subr.bf16.mxu0 %v497_v8 }
 0x97a   :  { %1626 = vmatpush3.bf16.msra.mxu0 %v497_v8 }
 0x97c   :  { %v499_v10 = vpop.permute.xlu1 %498 }
 0x97d   :  { %1627 = vmatprep.subr.bf16.mxu0 %v499_v10 }
 0x97e   :  { %1628 = vmatpush3.bf16.msra.mxu0 %v499_v10 }
 0x97f   :  { %1633 = vmatprep.subr.bf16.mxu0 %v1948_v1  ;;  %v1791_v12 = vpop.eup %1790 }
 0x980   :  { %v1793_v13 = vpop.eup %1792  ;;  %v493_v16 = vmul.f32 %v1791_v12, %v1787_v63 }
 0x981   :  { %v1795_v14 = vpop.eup %1794  ;;  %v490_v17 = vmul.f32 %v1793_v13, %v1785_v62  ;;  %v1506_v13 = vld [vmem:[#allocation8 + $0x3b] ss:$0 sm:$0xff] }
 0x982   :  { %v492_v19 = vmul.f32 %v1795_v14, %v1783_v60  ;;  %v1759_v60 = vld [vmem:[#allocation6 + $0x60] sm:$0xff]  }
 0x983   :  { %v1797_v15 = vpop.eup %1796 }
 0x984   :  { %v491_v18 = vmul.f32 %v1797_v15, %v1789_v3  ;;  %v495_v21 = vpack.c.bf16 %v493_v16, %v492_v19  ;;  %v1761_v3 = vld [vmem:[#allocation6 + $0x70] sm:$0xff]  }
 0x986   :  { %v494_v20 = vpack.c.bf16 %v491_v18, %v490_v17 }
 0x988   :  { %1629 = vmatprep.mubr.msk.bf16.mxu0 %vm169_vm3, %v494_v20 }
 0x989   :  { %1630 = vmatmul.mubr.msk.bf16.vlgmr.msra.gmra.mrb[8].mxu0 %vm169_vm3, %v495_v21 }
 0x98a   :  { %1637 = vmatprep.mubr.msk.bf16.mxu0 %vm1949_vm1, %v1948_v1  ;;  %1634 = vmatpush3.bf16.msra.mxu0 %v1754_v22 }
 0x98b   :  { %1635 = vmatprep.subr.bf16.mxu0 %v1948_v1 }
 0x98e   :  { %1636 = vmatpush3.bf16.msra.mxu0 %v1755_v23 }
 0x98f   :  { %1649 = vmatprep.subr.bf16.mxu0 %v1948_v1 }
 0xa5c   :  { %v1631_v24 = vpop.f32.mrb[8].mxu0 }
 0xa5d   :  { %v542_v25 = vpop.f32.mrb[9].mxu0 }
 0xa5e   :  { %v1632_v26 = vpop.f32.mrb[10].mxu0 }
 0xa5f   :  { %566 = vrot.lane.b32.xlu0 %v1632_v26, %s1955_s10  ;;  %v545_v27 = vpop.f32.mrb[11].mxu0 }
 0xa60   :  { %558 = vrot.lane.b32.xlu1 %v545_v27, %s1946_s27 }
 0xa64   :  { %562 = vrot.lane.b32.xlu1 %v1631_v24, %s1956_s11 }
 0xad1   :  { %v567_v32 = vpop.permute.xlu0 %566 }
 0xad2   :  { %v559_v28 = vpop.permute.xlu1 %558 }
 0xad3   :  { %v569_v29 = vsel %vm380_vm11, %v542_v25, %v559_v28  ;;  %v809_v25 = vstv %s1489_s13 }
 0xad6   :  { %v563_v31 = vpop.permute.xlu1 %562 }
 0xad7   :  { %v570_v33 = vsel %vm96_vm0, %v569_v29, %v563_v31 }
 0xad8   :  { %v572_v34 = vsel %vm571_vm12, %v570_v33, %v567_v32 }
 0xad9   :  { %v577_v37 = vpack.c.bf16 %v572_v34, %v572_v34 }
 0xadb   :  { %1638 = vmatmul.mubr.msk.bf16.vlgmr.msra.gmra.mrb[12].mxu0 %vm169_vm3, %v577_v37 }
 0xadc   :  { %1657 = vmatprep.mubr.msk.bf16.mxu0 %vm1949_vm1, %v1948_v1  ;;  %1650 = vmatpush3.bf16.msra.mxu0 %v1758_v59 }
 0xadd   :  { %1651 = vmatprep.subr.bf16.mxu0 %v1948_v1 }
 0xae0   :  { %1652 = vmatpush3.bf16.msra.mxu0 %v1759_v60 }
 0xae1   :  { %1653 = vmatprep.subr.bf16.mxu0 %v1948_v1 }
 0xae4   :  { %1654 = vmatpush3.bf16.msra.mxu0 %v1760_v2 }
 0xae5   :  { %1655 = vmatprep.subr.bf16.mxu0 %v1948_v1 }
 0xae8   :  { %1656 = vmatpush3.bf16.msra.mxu0 %v1761_v3 }
 0xbae   :  { %v631_v39 = vpop.f32.mrb[12].mxu0 }
 0xbaf   :  { %v632_v40 = vadd.f32 %v1498_v38, %v631_v39  ;;  %v1639_v41 = vpop.f32.mrb[13].mxu0 }
 0xbb0   :  { %v634_v42 = vpop.f32.mrb[14].mxu0  ;;  %v1763_v41 = vld [vmem:[#allocation6 + $0x80] sm:$0xff]  }
 0xbb1   :  { %v1640_v44 = vpop.f32.mrb[15].mxu0  ;;  %v637_v45 = vmul.f32 %v632_v40, %v632_v40 }
 0xbb3   :  { %v638_v46 = vsel %vm169_vm3, %v637_v45, 0.0 }
 0xbb4   :  { %639 = vadd.xlane.f32.xlu1 %v638_v46 }
 0xc41   :  { %v640_v47 = vpop.xlane.xlu1 %639 }
 0xc42   :  { %v641_v48 = vmax.f32 %v640_v47, 1e-24 }
 0xc44   :  { %1798 = vrsqrt.f32 %v641_v48  ;;  %v1514_v48 = vld [vmem:[#allocation8 + $0x40] ss:$0 sm:$0xff] }
 0xc4e   :  { %v1799_v49 = vpop.eup %1798 }
 0xc4f   :  { %v643_v50 = vmul.f32 %v1799_v49, %v632_v40  ;;  %v1762_v40 = vld [vmem:[#allocation6 + $0x78] sm:$0xff]  }
 0xc51   :  { %v644_v52 = vsub.f32 %v643_v50, %v2048_v11 }
 0xc53   :  { %v646_v53 = vmul.f32 %v645_v51, %v644_v52 }
 0xc55   :  { %v647_v54 = vadd.f32 %v646_v53, %v2048_v11 }
 0xc57   :  { %v648_v55 = vmul.f32 %v647_v54, %v647_v54 }
 0xc59   :  { %v649_v56 = vsel %vm169_vm3, %v648_v55, 0.0 }
 0xc5a   :  { %650 = vadd.xlane.f32.xlu0 %v649_v56 }
 0xce7   :  { %v651_v11 = vpop.xlane.xlu0 %650 }
 0xce8   :  { %v652_v61 = vmax.f32 %v651_v11, 1e-24 }
 0xcea   :  { %1800 = vrsqrt.f32 %v652_v61 }
 0xcf4   :  { %v1801_v62 = vpop.eup %1800 }
 0xcf5   :  { %v654_v63 = vmul.f32 %v1801_v62, %v647_v54 }
 0xcf7   :  { %v659_v0 = vpack.c.bf16 %v654_v63, %v654_v63 }
 0xcf9   :  { %1646 = vmatmul.mubr.msk.bf16.vlgmr.msra.gmra.mrb[8].mxu1 %vm169_vm3, %v659_v0 }
 0xcfa   :  { %1665 = vmatprep.mubr.msk.bf16.mxu1 %vm1949_vm1, %v1948_v1  ;;  %1662 = vmatpush3.bf16.msra.mxu1 %v1762_v40 }
 0xcfb   :  { %1663 = vmatprep.subr.bf16.mxu1 %v1948_v1 }
 0xcfe   :  { %1664 = vmatpush3.bf16.msra.mxu1 %v1763_v41 }
 0xdcc   :  { %v713_v5 = vpop.f32.mrb[8].mxu1 }
 0xdcd   :  { %v714_v6 = vadd.f32 %v1502_v4, %v713_v5  ;;  %v1647_v7 = vpop.f32.mrb[9].mxu1 }
 0xdce   :  { %v716_v8 = vpop.f32.mrb[10].mxu1 }
 0xdcf   :  { %v719_v9 = vmax.f32 %v714_v6, 0.0  ;;  %v1648_v10 = vpop.f32.mrb[11].mxu1 }
 0xdd1   :  { %v728_v12 = vpack.c.bf16 %v719_v9, %v719_v9 }
 0xdd3   :  { %1658 = vmatmul.mubr.msk.bf16.vlgmr.msra.gmra.mrb[16].mxu0 %vm757_vm13, %v728_v12 }
 0xea6   :  { %v795_v14 = vpop.f32.mrb[16].mxu0 }
 0xea7   :  { %v796_v15 = vadd.f32 %v1506_v13, %v795_v14  ;;  %v1659_v16 = vpop.f32.mrb[17].mxu0 }
 0xea8   :  { %v798_v17 = vpop.f32.mrb[18].mxu0 }
 0xea9   :  { %v1660_v18 = vpop.f32.mrb[19].mxu0  ;;  %v801_v19 = vmul.f32 %v796_v15, %v796_v15 }
 0xeab   :  { %v802_v20 = vsel %vm169_vm3, %v801_v19, 0.0 }
 0xeac   :  { %803 = vadd.xlane.f32.xlu0 %v802_v20 }
 0xf39   :  { %v804_v21 = vpop.xlane.xlu0 %803 }
 0xf3a   :  { %v805_v22 = vmax.f32 %v804_v21, 1e-24 }
 0xf3c   :  { %1802 = vrsqrt.f32 %v805_v22 }
 0xf46   :  { %v1803_v23 = vpop.eup %1802 }
 0xf47   :  { %v807_v24 = vmul.f32 %v1803_v23, %v796_v15 }
 0xf49   :  { %v808_v26 = vsub.f32 %v807_v24, %v654_v63 }
 0xf4b   :  { %v810_v27 = vmul.f32 %v809_v25, %v808_v26 }
 0xf4d   :  { %v811_v28 = vadd.f32 %v810_v27, %v654_v63 }
 0xf4f   :  { %v812_v29 = vmul.f32 %v811_v28, %v811_v28 }
 0xf51   :  { %v813_v31 = vsel %vm169_vm3, %v812_v29, 0.0 }
 0xf52   :  { %814 = vadd.xlane.f32.xlu0 %v813_v31 }
 0xfdf   :  { %v815_v32 = vpop.xlane.xlu0 %814 }
 0xfe0   :  { %v816_v33 = vmax.f32 %v815_v32, 1e-24 }
 0xfe2   :  { %1804 = vrsqrt.f32 %v816_v33 }
 0xfec   :  { %v1805_v34 = vpop.eup %1804 }
 0xfed   :  { %v818_v37 = vmul.f32 %v1805_v34, %v811_v28 }
 0xfef   :  { %v825_v38 = vmul.f32 %v818_v37, %v818_v37 }
 0xff1   :  { %v826_v39 = vsel %vm169_vm3, %v825_v38, 0.0 }
 0xff2   :  { %827 = vadd.xlane.f32.xlu1 %v826_v39 }
0x107f   :  { %v828_v42 = vpop.xlane.xlu1 %827 }
0x1080   :  { %v829_v44 = vmax.f32 %v828_v42, 1e-24 }
0x1082   :  { %1806 = vrsqrt.f32 %v829_v44 }
0x108c   :  { %v1807_v45 = vpop.eup %1806 }
0x108d   :  { %v2132_v46 = vmul.f32 %v1807_v45, %v818_v37 }
0x108f   :  { %v836_v47 = vpack.c.bf16 %v2132_v46, %v2132_v46 }
0x1091   :  { %1666 = vmatmul.mubr.msk.bf16.vlgmr.msra.gmra.mrb[12].mxu1 %vm169_vm3, %v836_v47 }
0x1164   :  { %v890_v49 = vpop.f32.mrb[12].mxu1 }
0x1165   :  { %v891_v50 = vadd.f32 %v1514_v48, %v890_v49  ;;  %v1667_v51 = vpop.f32.mrb[13].mxu1 }
0x1166   :  { %v893_v52 = vpop.f32.mrb[14].mxu1 }
0x1167   :  { %900 = vrot.lane.b32.xlu1 %v891_v50, %s1952_s7  ;;  %897 = vrot.lane.b32.xlu0 %v891_v50, %s1953_s8  ;;  %v1668_v53 = vpop.f32.mrb[15].mxu1 }
0x1168   :  { %v1764_v53 = vld [vmem:[#allocation6 + $0x88] sm:$0xff]  }
0x116b   :  { %903 = vrot.lane.b32.xlu1 %v891_v50, %s1954_s9 }
0x11d9   :  { %v901_v54 = vpop.permute.xlu1 %900  ;;  %v898_v55 = vpop.permute.xlu0 %897 }
0x11da   :  { %v2140_v56 = vpack.c.bf16 %v898_v55, %v891_v50 }
0x11dc   :  { %910 = vrot.lane.b32.xlu1 %v2140_v56, %s1950_s2  ;;  %1673 = vmatprep.mubr.msk.bf16.mxu1 %vm380_vm11, %v2140_v56 }
0x11dd   :  { %v904_v57 = vpop.permute.xlu1 %903 }
0x11de   :  { %v907_v58 = vpack.c.bf16 %v904_v57, %v901_v54  ;;  %v1765_v54 = vld [vmem:[#allocation6 + $0x90] sm:$0xff]  }
0x11e0   :  { %912 = vrot.lane.b32.xlu0 %v907_v58, %s1950_s2 }
0x124e   :  { %v911_v59 = vpop.permute.xlu1 %910 }
0x124f   :  { %v921_v60 = vsel %vm380_vm11, %v911_v59, 0  ;;  %1729 = vmatprep.subr.msk.bf16.mxu1 %vm380_vm11, %v911_v59 }
0x1250   :  { %1670 = vmatpush3.bf16.xpose.msra.mxu1 %v921_v60 }
0x1252   :  { %v913_v11 = vpop.permute.xlu0 %912 }
0x1253   :  { %1730 = vmatprep.subr.msk.bf16.mxu1 %vm380_vm11, %v913_v11  ;;  %v924_v61 = vsel %vm380_vm11, %v913_v11, 0 }
0x1258   :  { %1672 = vmatpush3.bf16.xpose.msra.mxu1 %v924_v61 }
0x1259   :  { %1693 = vmatprep.subr.bf16.mxu1 %v1948_v1 }
0x125f   :  { %1674 = vmatmul.mubr.msk.bf16.vlgmr.msra.gmra.mrb[16].mxu1 %vm380_vm11, %v907_v58 }
0x1260   :  { %1697 = vmatprep.mubr.msk.bf16.mxu1 %vm1949_vm1, %v1948_v1 }
0x1332   :  { %v1675_v62 = vpop.f32.mrb[16].mxu1 }
0x1333   :  { %v977_v63 = vmul.f32 0.35355338, %v1675_v62  ;;  %v960_v0 = vpop.f32.mrb[17].mxu1 }
0x1334   :  { %v975_v2 = vmul.f32 0.35355338, %v960_v0  ;;  %v1676_v3 = vpop.f32.mrb[18].mxu1 }
0x1335   :  { %v963_v4 = vpop.f32.mrb[19].mxu1  ;;  %v981_v5 = vadd.f32 %v977_v63, %v2079_v36  ;;  %v978_v8 = vmul.f32 0.35355338, %v1676_v3 }
0x1336   :  { %v976_v6 = vmul.f32 0.35355338, %v963_v4  ;;  %v979_v7 = vadd.f32 %v975_v2, %v2075_v30  ;;  %v1522_v2 = vld [vmem:[#allocation8 + $0x41] ss:$0 sm:$0xff] }
0x1337   :  { %v989_v9 = vsel %vm169_vm3, %v981_v5, -inf  ;;  %v982_v14 = vadd.f32 %v978_v8, %v2085_v43 }
0x1338   :  { %990 = vmax.xlane.f32.xlu0 %v989_v9  ;;  %v983_v10 = vsel %vm169_vm3, %v979_v7, -inf  ;;  %v980_v12 = vadd.f32 %v976_v6, %v2077_v35 }
0x1339   :  { %984 = vmax.xlane.f32.xlu1 %v983_v10  ;;  %v992_v15 = vsel %vm169_vm3, %v982_v14, -inf }
0x133a   :  { %v986_v13 = vsel %vm169_vm3, %v980_v12, -inf }
0x133c   :  { %987 = vmax.xlane.f32.xlu0 %v986_v13 }
0x1340   :  { %993 = vmax.xlane.f32.xlu0 %v992_v15 }
0x13c5   :  { %v991_v36 = vpop.xlane.xlu0 %990 }
0x13c6   :  { %v997_v16 = vsub.f32 %v981_v5, %v991_v36  ;;  %v985_v30 = vpop.xlane.xlu1 %984 }
0x13c7   :  { %v995_v17 = vsub.f32 %v979_v7, %v985_v30 }
0x13c8   :  { %v1003_v18 = vmul.f32 1.442695, %v997_v16 }
0x13c9   :  { %v999_v19 = vmul.f32 1.442695, %v995_v17  ;;  %v988_v20 = vpop.xlane.xlu0 %987 }
0x13ca   :  { %1808 = vpow2.f32 %v1003_v18  ;;  %v996_v21 = vsub.f32 %v980_v12, %v988_v20  ;;  %v1767_v20 = vld [vmem:[#allocation6 + $0xa0] sm:$0xff]  }
0x13cb   :  { %1810 = vpow2.f32 %v999_v19  ;;  %v1766_v19 = vld [vmem:[#allocation6 + $0x98] sm:$0xff]  }
0x13cc   :  { %v1001_v23 = vmul.f32 1.442695, %v996_v21  ;;  %1694 = vmatpush3.bf16.msra.mxu1 %v1766_v19  ;;  %v1768_v21 = vld [vmem:[#allocation6 + $0xa8] sm:$0xff]  }
0x13cd   :  { %v994_v35 = vpop.xlane.xlu0 %993  ;;  %1695 = vmatprep.subr.bf16.mxu1 %v1948_v1 }
0x13ce   :  { %v998_v22 = vsub.f32 %v982_v14, %v994_v35  ;;  %v1769_v35 = vld [vmem:[#allocation6 + $0xb0] sm:$0xff]  }
0x13d0   :  { %v1005_v24 = vmul.f32 1.442695, %v998_v22  ;;  %1696 = vmatpush3.bf16.msra.mxu1 %v1767_v20 }
0x13d1   :  { %1713 = vmatprep.subr.bf16.mxu1 %v1948_v1 }
0x13d2   :  { %1812 = vpow2.f32 %v1005_v24 }
0x13d3   :  { %1814 = vpow2.f32 %v1001_v23 }
0x13d4   :  { %v1809_v43 = vpop.eup %1808 }
0x13d5   :  { %v1013_v25 = vsel %vm169_vm3, %v1809_v43, 0.0  ;;  %v1811_v26 = vpop.eup %1810 }
0x13d6   :  { %1014 = vadd.xlane.f32.xlu1 %v1013_v25  ;;  %v1007_v27 = vsel %vm169_vm3, %v1811_v26, 0.0  ;;  %v1770_v25 = vld [vmem:[#allocation6 + $0xb8] sm:$0xff]  }
0x13da   :  { %1008 = vadd.xlane.f32.xlu1 %v1007_v27  ;;  %v1526_v27 = vld [vmem:[#allocation8 + $0x42] ss:$0 sm:$0xff] }
0x13dc   :  { %v1813_v28 = vpop.eup %1812 }
0x13dd   :  { %v1016_v29 = vsel %vm169_vm3, %v1813_v28, 0.0  ;;  %v1815_v31 = vpop.eup %1814 }
0x13de   :  { %1017 = vadd.xlane.f32.xlu0 %v1016_v29  ;;  %v1010_v32 = vsel %vm169_vm3, %v1815_v31, 0.0 }
0x13e2   :  { %1011 = vadd.xlane.f32.xlu0 %v1010_v32 }
0x13eb   :  { %1029 = vrot.lane.b32.xlu1 %v2140_v56, %s1941_s25 }
0x13f8   :  { %1031 = vrot.lane.b32.xlu0 %v907_v58, %s1941_s25  ;;  %s1512_s25 = sld [smem:[#allocation9 + $0x1]] }
0x13fe   :  { %v1177_v15 = vstv %s1512_s25 }
0x1463   :  { %v1015_v33 = vpop.xlane.xlu1 %1014 }
0x1467   :  { %v1009_v34 = vpop.xlane.xlu1 %1008 }
0x146b   :  { %v1030_v37 = vpop.permute.xlu1 %1029  ;;  %v1018_v38 = vpop.xlane.xlu0 %1017 }
0x146c   :  { %1677 = vmatprep.subr.bf16.mxu0 %v1030_v37  ;;  %1816 = vrcp.f32 %v1018_v38  ;;  %v1530_v38 = vld [vmem:[#allocation8 + $0x43] ss:$0 sm:$0xff] }
0x146d   :  { %1678 = vmatpush3.bf16.msra.mxu0 %v1030_v37  ;;  %1818 = vrcp.f32 %v1009_v34 }
0x146e   :  { %1820 = vrcp.f32 %v1015_v33 }
0x146f   :  { %v1012_v39 = vpop.xlane.xlu0 %1011 }
0x1470   :  { %1822 = vrcp.f32 %v1012_v39 }
0x1473   :  { %v1032_v40 = vpop.permute.xlu0 %1031 }
0x1474   :  { %1679 = vmatprep.subr.bf16.mxu0 %v1032_v40 }
0x1475   :  { %1680 = vmatpush3.bf16.msra.mxu0 %v1032_v40 }
0x1476   :  { %1685 = vmatprep.subr.bf16.mxu0 %v1948_v1  ;;  %v1817_v41 = vpop.eup %1816 }
0x1477   :  { %v1819_v42 = vpop.eup %1818  ;;  %v1026_v47 = vmul.f32 %v1817_v41, %v1813_v28 }
0x1478   :  { %v1821_v44 = vpop.eup %1820  ;;  %v1023_v48 = vmul.f32 %v1819_v42, %v1811_v26  ;;  %v1771_v26 = vld [vmem:[#allocation6 + $0xc0] sm:$0xff]  }
0x1479   :  { %v1025_v50 = vmul.f32 %v1821_v44, %v1809_v43 }
0x147a   :  { %v1823_v45 = vpop.eup %1822 }
0x147b   :  { %v1024_v49 = vmul.f32 %v1823_v45, %v1815_v31  ;;  %v1028_v52 = vpack.c.bf16 %v1026_v47, %v1025_v50 }
0x147d   :  { %v1027_v51 = vpack.c.bf16 %v1024_v49, %v1023_v48 }
0x147f   :  { %1681 = vmatprep.mubr.msk.bf16.mxu0 %vm169_vm3, %v1027_v51 }
0x1480   :  { %1682 = vmatmul.mubr.msk.bf16.vlgmr.msra.gmra.mrb[20].mxu0 %vm169_vm3, %v1028_v52  ;;  %v1340_v52 = vstv %s1513_s1 }
0x1481   :  { %1689 = vmatprep.mubr.msk.bf16.mxu0 %vm1949_vm1, %v1948_v1  ;;  %1686 = vmatpush3.bf16.msra.mxu0 %v1764_v53 }
0x1482   :  { %1687 = vmatprep.subr.bf16.mxu0 %v1948_v1 }
0x1485   :  { %1688 = vmatpush3.bf16.msra.mxu0 %v1765_v54 }
0x1486   :  { %1701 = vmatprep.subr.bf16.mxu0 %v1948_v1 }
0x1553   :  { %v1683_v55 = vpop.f32.mrb[20].mxu0 }
0x1554   :  { %1095 = vrot.lane.b32.xlu1 %v1683_v55, %s1956_s11  ;;  %v1075_v56 = vpop.f32.mrb[21].mxu0 }
0x1555   :  { %v1684_v57 = vpop.f32.mrb[22].mxu0 }
0x1556   :  { %v1078_v58 = vpop.f32.mrb[23].mxu0 }
0x1558   :  { %1091 = vrot.lane.b32.xlu1 %v1078_v58, %s1946_s27 }
0x155c   :  { %1099 = vrot.lane.b32.xlu1 %v1684_v57, %s1955_s10 }
0x15c6   :  { %v1096_v59 = vpop.permute.xlu1 %1095 }
0x15ca   :  { %v1092_v60 = vpop.permute.xlu1 %1091 }
0x15cb   :  { %v1102_v11 = vsel %vm380_vm11, %v1075_v56, %v1092_v60 }
0x15cc   :  { %v1103_v61 = vsel %vm96_vm0, %v1102_v11, %v1096_v59 }
0x15ce   :  { %v1100_v62 = vpop.permute.xlu1 %1099 }
0x15cf   :  { %v1104_v63 = vsel %vm571_vm12, %v1103_v61, %v1100_v62  ;;  %v81_v61 = vld [vmem:[#allocation8 + $0x30] sm:$0x3] }
0x15d0   :  { %v1109_v0 = vpack.c.bf16 %v1104_v63, %v1104_v63 }
0x15d2   :  { %1690 = vmatmul.mubr.msk.bf16.vlgmr.msra.gmra.mrb[24].mxu0 %vm169_vm3, %v1109_v0  ;;  %v1350_v0 = vpack.c.bf16 %v81_v61, %v81_v61 }
0x15d3   :  { %1709 = vmatprep.mubr.msk.bf16.mxu0 %vm1949_vm1, %v1948_v1  ;;  %1702 = vmatpush3.bf16.msra.mxu0 %v1768_v21 }
0x15d4   :  { %1703 = vmatprep.subr.bf16.mxu0 %v1948_v1 }
0x15d7   :  { %1704 = vmatpush3.bf16.msra.mxu0 %v1769_v35 }
0x15d8   :  { %1705 = vmatprep.subr.bf16.mxu0 %v1948_v1 }
0x15db   :  { %1706 = vmatpush3.bf16.msra.mxu0 %v1770_v25 }
0x15dc   :  { %1707 = vmatprep.subr.bf16.mxu0 %v1948_v1 }
0x15df   :  { %1708 = vmatpush3.bf16.msra.mxu0 %v1771_v26 }
0x16a5   :  { %v1163_v3 = vpop.f32.mrb[24].mxu0 }
0x16a6   :  { %v1164_v4 = vadd.f32 %v1522_v2, %v1163_v3  ;;  %v1691_v5 = vpop.f32.mrb[25].mxu0  ;;  %v1772_v2 = vld [vmem:[#allocation6 + $0x18] sm:$0xff]   ;;  %v1773_v3 = vld [vmem:[#allocation6 + $0x20] sm:$0xff]  }
0x16a7   :  { %v1166_v6 = vpop.f32.mrb[26].mxu0 }
0x16a8   :  { %v1692_v7 = vpop.f32.mrb[27].mxu0  ;;  %v1169_v8 = vmul.f32 %v1164_v4, %v1164_v4 }
0x16aa   :  { %v1170_v9 = vsel %vm169_vm3, %v1169_v8, 0.0 }
0x16ab   :  { %1171 = vadd.xlane.f32.xlu0 %v1170_v9  ;;  %v1537_v9 = vld [vmem:[#allocation8 + $0x4] ss:$0 sm:$0xff] }
0x1738   :  { %v1172_v10 = vpop.xlane.xlu0 %1171 }
0x1739   :  { %v1173_v12 = vmax.f32 %v1172_v10, 1e-24 }
0x173b   :  { %1824 = vrsqrt.f32 %v1173_v12 }
0x1745   :  { %v1825_v13 = vpop.eup %1824 }
0x1746   :  { %v1175_v14 = vmul.f32 %v1825_v13, %v1164_v4 }
0x1748   :  { %v1176_v36 = vsub.f32 %v1175_v14, %v2132_v46 }
0x174a   :  { %v1178_v16 = vmul.f32 %v1177_v15, %v1176_v36 }
0x174c   :  { %v1179_v30 = vadd.f32 %v1178_v16, %v2132_v46 }
0x174e   :  { %v1180_v17 = vmul.f32 %v1179_v30, %v1179_v30 }
0x1750   :  { %v1181_v18 = vsel %vm169_vm3, %v1180_v17, 0.0 }
0x1751   :  { %1182 = vadd.xlane.f32.xlu1 %v1181_v18 }
0x17de   :  { %v1183_v46 = vpop.xlane.xlu1 %1182 }
0x17df   :  { %v1184_v22 = vmax.f32 %v1183_v46, 1e-24 }
0x17e1   :  { %1826 = vrsqrt.f32 %v1184_v22 }
0x17eb   :  { %v1827_v23 = vpop.eup %1826 }
0x17ec   :  { %v1186_v24 = vmul.f32 %v1827_v23, %v1179_v30 }
0x17ee   :  { %v1191_v43 = vpack.c.bf16 %v1186_v24, %v1186_v24 }
0x17f0   :  { %1698 = vmatmul.mubr.msk.bf16.vlgmr.msra.gmra.mrb[20].mxu1 %vm169_vm3, %v1191_v43 }
0x17f1   :  { %1715 = vmatprep.mubr.msk.bf16.mxu1 %vm1949_vm1, %v1948_v1 }
0x18c3   :  { %v1245_v28 = vpop.f32.mrb[20].mxu1 }
0x18c4   :  { %v1246_v29 = vadd.f32 %v1526_v27, %v1245_v28  ;;  %v1699_v31 = vpop.f32.mrb[21].mxu1 }
0x18c5   :  { %v1248_v32 = vpop.f32.mrb[22].mxu1 }
0x18c6   :  { %v1251_v33 = vmax.f32 %v1246_v29, 0.0  ;;  %v1700_v34 = vpop.f32.mrb[23].mxu1 }
0x18c8   :  { %v1260_v37 = vpack.c.bf16 %v1251_v33, %v1251_v33 }
0x18ca   :  { %1710 = vmatmul.mubr.msk.bf16.vlgmr.msra.gmra.mrb[28].mxu0 %vm757_vm13, %v1260_v37 }
0x199d   :  { %v1326_v39 = vpop.f32.mrb[28].mxu0 }
0x199e   :  { %v1327_v40 = vadd.f32 %v1530_v38, %v1326_v39  ;;  %v1711_v41 = vpop.f32.mrb[29].mxu0 }
0x199f   :  { %v1329_v42 = vpop.f32.mrb[30].mxu0 }
0x19a0   :  { %v1712_v44 = vpop.f32.mrb[31].mxu0  ;;  %v1332_v45 = vmul.f32 %v1327_v40, %v1327_v40 }
0x19a2   :  { %v1333_v47 = vsel %vm169_vm3, %v1332_v45, 0.0 }
0x19a3   :  { %1334 = vadd.xlane.f32.xlu0 %v1333_v47 }
0x1a30   :  { %v1335_v48 = vpop.xlane.xlu0 %1334 }
0x1a31   :  { %v1336_v49 = vmax.f32 %v1335_v48, 1e-24 }
0x1a33   :  { %1828 = vrsqrt.f32 %v1336_v49 }
0x1a3d   :  { %v1829_v50 = vpop.eup %1828 }
0x1a3e   :  { %v1338_v51 = vmul.f32 %v1829_v50, %v1327_v40 }
0x1a40   :  { %v1339_v53 = vsub.f32 %v1338_v51, %v1186_v24 }
0x1a42   :  { %v1341_v54 = vmul.f32 %v1340_v52, %v1339_v53 }
0x1a44   :  { %v1342_v55 = vadd.f32 %v1341_v54, %v1186_v24 }
0x1a46   :  { %v1343_v56 = vmul.f32 %v1342_v55, %v1342_v55 }
0x1a48   :  { %v1344_v57 = vsel %vm169_vm3, %v1343_v56, 0.0 }
0x1a49   :  { %1345 = vadd.xlane.f32.xlu0 %v1344_v57 }
0x1ad6   :  { %v1346_v58 = vpop.xlane.xlu0 %1345 }
0x1ad7   :  { %v1347_v59 = vmax.f32 %v1346_v58, 1e-24 }
0x1ad9   :  { %1830 = vrsqrt.f32 %v1347_v59 }
0x1ae3   :  { %v1831_v60 = vpop.eup %1830 }
0x1ae4   :  { %v1349_v11 = vmul.f32 %v1831_v60, %v1342_v55 }
0x1ae6   :  { %v1351_v62 = vpack.c.bf16 %v1349_v11, %v1349_v11 }
0x1ae8   :  { %v1356_v63 = vsel %vm269_vm7, %v1351_v62, 0 }
0x1ae9   :  { %1714 = vmatpush3.bf16.msra.mxu1 %v1356_v63 }
0x1aea   :  { %1719 = vmatprep.subr.bf16.mxu1 %v1948_v1 }
0x1aec   :  { %1716 = vmatmul.mubr.msk.bf16.vlgmr.msra.gmra.mrb[24].mxu1 %vm380_vm11, %v1350_v0 }
0x1aed   :  { %1720 = vmatpush3.bf16.msra.mxu1 %v1772_v2  ;;  %1723 = vmatprep.mubr.msk.bf16.mxu1 %vm1949_vm1, %v1948_v1 }
0x1aee   :  { %1721 = vmatprep.subr.bf16.mxu1 %v1948_v1 }
0x1af1   :  { %1722 = vmatpush3.bf16.msra.mxu1 %v1773_v3 }
0x1bbf   :  { %v1392_v4 = vpop.f32.mrb[24].mxu1 }
0x1bc0   :  { %v1402_v5 = vpack.c.bf16 %v1392_v4, %v1392_v4  ;;  %v1717_v6 = vpop.f32.mrb[25].mxu1 }
0x1bc1   :  { %v1395_v7 = vpop.f32.mrb[26].mxu1 }
0x1bc2   :  { %v1718_v8 = vpop.f32.mrb[27].mxu1  ;;  %1724 = vmatmul.mubr.msk.bf16.vlgmr.msra.gmra.mrb[28].mxu1 %vm169_vm3, %v1402_v5 }
0x1c95   :  { %v1456_v10 = vpop.f32.mrb[28].mxu1 }
0x1c96   :  { %v1457_v12 = vadd.f32 %v1537_v9, %v1456_v10  ;;  %v1725_v13 = vpop.f32.mrb[29].mxu1 }
0x1c97   :  { %v1459_v14 = vpop.f32.mrb[30].mxu1 }
0x1c98   :  { %1462 = vst [vmem:[#allocation10] sm:$0x3] %v1457_v12  ;;  %v1726_v15 = vpop.f32.mrb[31].mxu1 }
0x1c99   :  { %1921 = shalt.err (!%p1918_p5)
}
0x1c9a   :  { %s1922_s19 = scalar_lea.hbm %s2224_s4, 32 }
0x1c9b   :  { %p1923_p6 = scmp.ne.s32.totalorder %s2224_s4, %s1922_s19  ;;  %p1926_p7 = scmp.lt.u32.totalorder %s1922_s19, %s2224_s4 }
0x1c9d   :  { %p1928_p8 = pnand %p1926_p7, %p1923_p6 }
0x1c9f   :  { %1931 = shalt.err (!%p1928_p8)
}
0x1ca0   :  { %1472 = dma.vmem_to_hbm [thread:$0]  %s1470_s15, 32, %s2224_s4, [#allocation4]  }
0x1ca1   :  { %1938 = dma.done.wait [#allocation4], 32  }
0x1ca2   :  { %1939 = vsyncadd [#allocation4], 4294967264 }
0x1ca3   :  { %1476 = vsyncpa [#allocation3], 1 }
0x1ca4   :  { %1477 = vsyncpa [#allocation7], 1 }
0x1ca5   :  { %1478 = vsyncpa [#allocation4], 1 }
0x1ca6   :  { %1479 = vsyncpa [#allocation5], 1 }

</bundles_post_ra>
